<compile_context>
chip_gen: v7x
topology: tpu7x:2x2x1
jax: 0.10.0
libtpu: 0.0.40
codegen_flags: <defaults>
</compile_context>

<pallas_src>
import functools

import jax
import jax.numpy as jnp
import numpy as np
from jax.experimental import pallas as pl
from jax.experimental.pallas import tpu as pltpu


def _mha_kernel(x_ref, wqkv_ref, bqkv_ref, wo_ref, bo_ref, o_ref, ctx_ref, *,
                b_tile, seq_len, num_heads, head_size, hidn_size):
    bt, S, H = b_tile, seq_len, hidn_size
    nh, hd = num_heads, head_size
    d_all = nh * hd
    rows = bt * S

    # (bt, S, H) -> (bt*S, H): batch folded into the matmul M dimension.
    x = x_ref[...].reshape(rows, H)
    if x_ref.dtype != jnp.bfloat16:
        x = x.astype(jnp.bfloat16)

    # Fused, lane-dense QKV projection for all heads at once:
    # (bt*S, H) @ (H, 3*nh*hd) -- bf16 MXU operands, f32 accumulation, f32
    # bias add, then a single cast back to bf16 (the only resident qkv copy).
    # 1/sqrt(hd) has already been folded into Wq / bq in the wrapper.
    qkv = (jnp.dot(x, wqkv_ref[...], preferred_element_type=jnp.float32)
           + bqkv_ref[...]).astype(jnp.bfloat16)

    # Per-head attention.  Each head's context goes (bf16) into the VMEM
    # scratch at its lane offset so the output projection can be a single
    # K=d_all matmul after the loop.
    # TODO(synk): for hd < 128 the per-head lane slices are not 128-aligned;
    #             processing 128//hd heads per batched matmul (or zero-padding
    #             hd in the fused layout) would avoid masked extracts.
    for n in range(nh):  # static unroll; nh is small
        q_n = qkv[:, n * hd:(n + 1) * hd].reshape(bt, S, hd)
        k_n = qkv[:, d_all + n * hd:
                  d_all + (n + 1) * hd].reshape(bt, S, hd)
        v_n = qkv[:, 2 * d_all + n * hd:
                  2 * d_all + (n + 1) * hd].reshape(bt, S, hd)

        # Scores (bt, S, S): bf16 MXU operands, f32 accumulation.
        s = jnp.einsum('bqd,bkd->bqk', q_n, k_n,
                       preferred_element_type=jnp.float32)

        # Numerically-stable softmax in f32; divide -> EUP reciprocal, with
        # the normalization folded into the (bt, S, hd) context (cheaper than
        # normalizing the (bt, S, S) probabilities).
        s = s - jnp.max(s, axis=-1, keepdims=True)
        p = jnp.exp(s)
        inv_l = pl.reciprocal(jnp.sum(p, axis=-1, keepdims=True), approx=True)

        ctx = jnp.einsum('bqk,bkd->bqd', p.astype(jnp.bfloat16), v_n,
                         preferred_element_type=jnp.float32) * inv_l

        ctx_ref[:, n * hd:(n + 1) * hd] = (
            ctx.reshape(rows, hd).astype(jnp.bfloat16))

    # Single fused output projection over all heads:
    # (rows, d_all) @ (d_all, H), bf16 MXU operands, f32 accumulation + bias.
    out = jnp.dot(ctx_ref[...], wo_ref[...],
                  preferred_element_type=jnp.float32) + bo_ref[...]
    o_ref[...] = out.reshape(bt, S, H).astype(o_ref.dtype)


def _vmem_budget():
    """Per-generation scoped-VMEM limit and the tile-sizing budget (bytes)."""
    kind = ""
    try:
        kind = jax.devices()[0].device_kind.lower()
    except Exception:
        pass
    if "v7" in kind:
        # v7x: 64 MiB physical per TensorCore -- raise the 32 MiB default but
        # leave headroom.
        limit = 48 * 1024 * 1024
    elif "v2" in kind or "v3" in kind:
        limit = 14 * 1024 * 1024
    else:
        # v4 / v5e / v5p / v6e: 128 MiB physical, 16-32 MiB scoped by default.
        limit = 100 * 1024 * 1024
    return limit, int(limit * 0.85)


def _choose_b_tile(B, S, H, d_all, hd, x_itemsize, out_itemsize, budget_bytes):
    """Largest divisor of B whose per-step working set fits the VMEM budget,
    preferring >= 2 grid steps (v7x dual TensorCore + pipeline overlap)."""
    def working_set(bt):
        rows = bt * S
        io_blocks = 2 * rows * H * (x_itemsize + out_itemsize)  # dbl-buffered x & o
        weights = (H * 3 * d_all) * 2 + (3 * d_all) * 4 + (d_all * H) * 2 + H * 4
        qkv = rows * 3 * d_all * (4 + 2)       # f32 matmul result + bf16 copy
        x_bf16 = rows * H * 2
        ctx_scratch = rows * d_all * 2
        scores = bt * S * S * (4 + 4 + 2)      # s + p (f32) + p (bf16) co-live
        ctx_head = bt * S * hd * 4
        out_f32 = rows * H * 4
        return (io_blocks + weights + qkv + x_bf16 + ctx_scratch
                + scores + ctx_head + out_f32)

    divisors = [d for d in range(1, B + 1) if B % d == 0]
    fitting = [d for d in divisors if working_set(d) <= budget_bytes]
    if not fitting:
        return 1
    multi_step = [d for d in fitting if B // d >= 2]
    return max(multi_step) if multi_step else max(fitting)


def _build_mha_call(B, S, H, nh, hd, b_tile, out_dtype, vmem_limit,
                    single_buffer_weights):
    d_all = nh * hd
    kernel = functools.partial(_mha_kernel, b_tile=b_tile, seq_len=S,
                               num_heads=nh, head_size=hd, hidn_size=H)

    def w_spec(shape):
        # Weights / biases have a constant index_map: request a single
        # pipeline buffer so they are not double-buffered in VMEM.
        if single_buffer_weights:
            return pl.BlockSpec(shape, lambda i: (0, 0),
                                pipeline_mode=pl.Buffered(buffer_count=1))
        return pl.BlockSpec(shape, lambda i: (0, 0))

    return pl.pallas_call(
        kernel,
        out_shape=jax.ShapeDtypeStruct((B, S, H), out_dtype),
        grid=(B // b_tile,),
        in_specs=[
            pl.BlockSpec((b_tile, S, H), lambda i: (i, 0, 0)),   # x
            w_spec((H, 3 * d_all)),                              # Wqkv (bf16)
            w_spec((1, 3 * d_all)),                              # bqkv (f32)
            w_spec((d_all, H)),                                  # Wo   (bf16)
            w_spec((1, H)),                                      # bo   (f32)
        ],
        out_specs=pl.BlockSpec((b_tile, S, H), lambda i: (i, 0, 0)),
        scratch_shapes=[pltpu.VMEM((b_tile * S, d_all), jnp.bfloat16)],
        compiler_params=pltpu.CompilerParams(
            dimension_semantics=("parallel",),
            vmem_limit_bytes=int(vmem_limit)),
    )


def multi_head_attention(x, wq, bq, wk, bk, wv, bv, wo, bo, *, b_tile=None):
    B, S, H = x.shape
    nh, _, hd = wq.shape
    d_all = nh * hd
    scale = 1.0 / (float(hd) ** 0.5)

    # Fuse per-head Q/K/V weights into one lane-dense (H, 3*nh*hd) operand.
    # Column order within each Q/K/V block is head-major, matching
    # torch.cat(dim=-1) head ordering and the rows of the backp weight.
    # 1/sqrt(hd) is folded into the Q weights/bias here (not in-kernel).
    def flat_w(w):  # (nh, H, hd) -> (H, nh*hd)
        return jnp.transpose(w, (1, 0, 2)).reshape(H, d_all)

    wqkv = jnp.concatenate([flat_w(wq) * scale, flat_w(wk), flat_w(wv)],
                           axis=1).astype(jnp.bfloat16)
    bqkv = jnp.concatenate([(bq * scale).reshape(1, d_all),
                            bk.reshape(1, d_all),
                            bv.reshape(1, d_all)], axis=1).astype(jnp.float32)
    wo_bf = wo.astype(jnp.bfloat16)
    bo_f32 = bo.reshape(1, H).astype(jnp.float32)

    vmem_limit, budget = _vmem_budget()
    if b_tile is None:
        b_tile = _choose_b_tile(B, S, H, d_all, hd,
                                x.dtype.itemsize, x.dtype.itemsize, budget)

    args = (x, wqkv, bqkv, wo_bf, bo_f32)
    try:
        return _build_mha_call(B, S, H, nh, hd, b_tile, x.dtype, vmem_limit,
                               single_buffer_weights=True)(*args)
    except Exception:
        # pipeline_mode=pl.Buffered(1) not supported by this JAX version:
        # fall back to default double-buffered weight blocks (correctness is
        # identical; only VMEM footprint differs).
        return _build_mha_call(B, S, H, nh, hd, b_tile, x.dtype, vmem_limit,
                               single_buffer_weights=False)(*args)


def _reference(x, wq, bq, wk, bk, wv, bv, wo, bo):
    # Pure-JAX f32 reference of the same forward (no dropout).
    nh, H, hd = wq.shape
    q = jnp.einsum('bsh,nhd->bnsd', x, wq) + bq[None, :, None, :]
    k = jnp.einsum('bsh,nhd->bnsd', x, wk) + bk[None, :, None, :]
    v = jnp.einsum('bsh,nhd->bnsd', x, wv) + bv[None, :, None, :]
    a = jnp.einsum('bnsd,bntd->bnst', q, k) / (hd ** 0.5)
    p = jax.nn.softmax(a, axis=-1)
    ctx = jnp.einsum('bnst,bntd->bnsd', p, v)
    cat = jnp.transpose(ctx, (0, 2, 1, 3)).reshape(x.shape[0], x.shape[1],
                                                   nh * hd)
    return cat @ wo + bo


if __name__ == "__main__":
    B, S, H = 2, 8, 32
    num_heads = 4
    hd = H // num_heads            # one_head_hidn_size = 8
    all_hd = num_heads * hd        # 32

    key = jax.random.PRNGKey(0)
    keys = jax.random.split(key, 10)

    # Deterministic param init (uniform, like nn.Linear default).
    def lin_init(k, fan_in, shape):
        bound = 1.0 / (fan_in ** 0.5)
        return jax.random.uniform(k, shape, jnp.float32, -bound, bound)

    x = jax.random.normal(keys[0], (B, S, H), jnp.float32)

    wq = lin_init(keys[1], H, (num_heads, H, hd))
    bq = lin_init(keys[2], H, (num_heads, hd))
    wk = lin_init(keys[3], H, (num_heads, H, hd))
    bk = lin_init(keys[4], H, (num_heads, hd))
    wv = lin_init(keys[5], H, (num_heads, H, hd))
    bv = lin_init(keys[6], H, (num_heads, hd))
    wo = lin_init(keys[7], all_hd, (all_hd, H))
    bo = lin_init(keys[8], all_hd, (1, H))

    out = multi_head_attention(x, wq, bq, wk, bk, wv, bv, wo, bo)
    out = jax.block_until_ready(out)

    ref = _reference(x, wq, bq, wk, bk, wv, bv, wo, bo)
    # bf16 MXU operands vs. the f32 reference -> bf16-level tolerance.
    np.testing.assert_allclose(np.asarray(out), np.asarray(ref),
                               rtol=2e-2, atol=2e-2)
    print("KERNEL_OK")
</pallas_src>

<mosaic_0001>
module attributes {stable_mosaic.version = 11 : i64} {
  func.func @_mha_kernel(%arg0: i32, %arg1: memref<1x8x32xf32, #tpu.memory_space<vmem>>, %arg2: memref<32x96xbf16, #tpu.memory_space<vmem>>, %arg3: memref<1x96xf32, #tpu.memory_space<vmem>>, %arg4: memref<32x32xbf16, #tpu.memory_space<vmem>>, %arg5: memref<1x32xf32, #tpu.memory_space<vmem>>, %arg6: memref<1x8x32xf32, #tpu.memory_space<vmem>>, %arg7: memref<8x32xbf16, #tpu.memory_space<vmem>>) attributes {dimension_semantics = [#tpu.dimension_semantics<parallel>], iteration_bounds = array<i64: 2>, scalar_prefetch = 0 : i64, scratch_operands = 1 : i64, tpu.core_type = #tpu.core_type<tc>, window_params = [{transform_indices = @transform_0, window_bounds = array<i64: 1, 8, 32>}, {pipeline_mode = #tpu.pipeline_mode<synchronous>, transform_indices = @transform_1, window_bounds = array<i64: 32, 96>}, {pipeline_mode = #tpu.pipeline_mode<synchronous>, transform_indices = @transform_2, window_bounds = array<i64: 1, 96>}, {pipeline_mode = #tpu.pipeline_mode<synchronous>, transform_indices = @transform_3, window_bounds = array<i64: 32, 32>}, {pipeline_mode = #tpu.pipeline_mode<synchronous>, transform_indices = @transform_4, window_bounds = array<i64: 1, 32>}, {transform_indices = @transform_5, window_bounds = array<i64: 1, 8, 32>}]} {
    %c0 = arith.constant 0 : index
    %c0_0 = arith.constant 0 : index
    %c0_1 = arith.constant 0 : index
    %0 = vector.load %arg1[%c0, %c0_0, %c0_1] : memref<1x8x32xf32, #tpu.memory_space<vmem>>, vector<1x8x32xf32>
    %1 = vector.shape_cast %0 : vector<1x8x32xf32> to vector<8x32xf32>
    %2 = arith.truncf %1 : vector<8x32xf32> to vector<8x32xbf16>
    %c0_2 = arith.constant 0 : index
    %c0_3 = arith.constant 0 : index
    %3 = vector.load %arg2[%c0_2, %c0_3] : memref<32x96xbf16, #tpu.memory_space<vmem>>, vector<32x96xbf16>
    %cst = arith.constant dense<0.000000e+00> : vector<8x96xf32>
    %4 = tpu.matmul %2, %3, %cst {dimension_numbers = #tpu.dot_dimension_numbers<[1], [0], [0], [1], [0, 0, 1, 1], [], []>} : vector<8x32xbf16>, vector<32x96xbf16>, vector<8x96xf32> -> vector<8x96xf32>
    %c0_4 = arith.constant 0 : index
    %c0_5 = arith.constant 0 : index
    %5 = vector.load %arg3[%c0_4, %c0_5] : memref<1x96xf32, #tpu.memory_space<vmem>>, vector<1x96xf32>
    %6 = vector.broadcast %5 : vector<1x96xf32> to vector<8x96xf32>
    %7 = arith.addf %4, %6 : vector<8x96xf32>
    %8 = arith.truncf %7 : vector<8x96xf32> to vector<8x96xbf16>
    %9 = vector.extract_strided_slice %8 {offsets = [0, 0], sizes = [8, 8], strides = [1, 1]} : vector<8x96xbf16> to vector<8x8xbf16>
    %10 = vector.shape_cast %9 : vector<8x8xbf16> to vector<1x8x8xbf16>
    %11 = vector.extract_strided_slice %8 {offsets = [0, 32], sizes = [8, 8], strides = [1, 1]} : vector<8x96xbf16> to vector<8x8xbf16>
    %12 = vector.shape_cast %11 : vector<8x8xbf16> to vector<1x8x8xbf16>
    %13 = vector.extract_strided_slice %8 {offsets = [0, 64], sizes = [8, 8], strides = [1, 1]} : vector<8x96xbf16> to vector<8x8xbf16>
    %14 = vector.shape_cast %13 : vector<8x8xbf16> to vector<1x8x8xbf16>
    "tpu.trace_start"() <{level = 10 : i32, message = "bqd,bkd->bqk"}> : () -> ()
    %cst_6 = arith.constant dense<0.000000e+00> : vector<1x8x8xf32>
    %15 = tpu.matmul %10, %12, %cst_6 {dimension_numbers = #tpu.dot_dimension_numbers<[2], [2], [1], [1], [0, 0, 0, 1, 1, 1], [0], [0]>} : vector<1x8x8xbf16>, vector<1x8x8xbf16>, vector<1x8x8xf32> -> vector<1x8x8xf32>
    "tpu.trace_stop"() : () -> ()
    %cst_7 = arith.constant dense<0xFF800000> : vector<1x8xf32>
    %16 = vector.multi_reduction <maximumf>, %15, %cst_7 [2] : vector<1x8x8xf32> to vector<1x8xf32>
    %17 = vector.shape_cast %16 : vector<1x8xf32> to vector<1x8x1xf32>
    %18 = vector.broadcast %17 : vector<1x8x1xf32> to vector<1x8x8xf32>
    %19 = arith.subf %15, %18 : vector<1x8x8xf32>
    %20 = math.exp %19 : vector<1x8x8xf32>
    %cst_8 = arith.constant dense<0.000000e+00> : vector<1x8xf32>
    %21 = vector.multi_reduction <add>, %20, %cst_8 [2] : vector<1x8x8xf32> to vector<1x8xf32>
    %22 = vector.shape_cast %21 : vector<1x8xf32> to vector<1x8x1xf32>
    %23 = tpu.reciprocal %22 {approx = true} : vector<1x8x1xf32> -> vector<1x8x1xf32>
    %24 = arith.truncf %20 : vector<1x8x8xf32> to vector<1x8x8xbf16>
    "tpu.trace_start"() <{level = 10 : i32, message = "bqk,bkd->bqd"}> : () -> ()
    %cst_9 = arith.constant dense<0.000000e+00> : vector<1x8x8xf32>
    %25 = tpu.matmul %24, %14, %cst_9 {dimension_numbers = #tpu.dot_dimension_numbers<[2], [1], [1], [2], [0, 0, 0, 1, 1, 2], [0], [0]>} : vector<1x8x8xbf16>, vector<1x8x8xbf16>, vector<1x8x8xf32> -> vector<1x8x8xf32>
    "tpu.trace_stop"() : () -> ()
    %26 = vector.broadcast %23 : vector<1x8x1xf32> to vector<1x8x8xf32>
    %27 = arith.mulf %25, %26 : vector<1x8x8xf32>
    %28 = vector.shape_cast %27 : vector<1x8x8xf32> to vector<8x8xf32>
    %29 = arith.truncf %28 : vector<8x8xf32> to vector<8x8xbf16>
    %c0_10 = arith.constant 0 : index
    %c0_11 = arith.constant 0 : index
    %30 = vector.load %arg7[%c0_10, %c0_11] : memref<8x32xbf16, #tpu.memory_space<vmem>>, vector<8x8xbf16>
    tpu.vector_store %arg7[%c0_10, %c0_11], %29 {strides = array<i32>} : memref<8x32xbf16, #tpu.memory_space<vmem>>, vector<8x8xbf16>,
    %31 = vector.extract_strided_slice %8 {offsets = [0, 8], sizes = [8, 8], strides = [1, 1]} : vector<8x96xbf16> to vector<8x8xbf16>
    %32 = vector.shape_cast %31 : vector<8x8xbf16> to vector<1x8x8xbf16>
    %33 = vector.extract_strided_slice %8 {offsets = [0, 40], sizes = [8, 8], strides = [1, 1]} : vector<8x96xbf16> to vector<8x8xbf16>
    %34 = vector.shape_cast %33 : vector<8x8xbf16> to vector<1x8x8xbf16>
    %35 = vector.extract_strided_slice %8 {offsets = [0, 72], sizes = [8, 8], strides = [1, 1]} : vector<8x96xbf16> to vector<8x8xbf16>
    %36 = vector.shape_cast %35 : vector<8x8xbf16> to vector<1x8x8xbf16>
    "tpu.trace_start"() <{level = 10 : i32, message = "bqd,bkd->bqk"}> : () -> ()
    %cst_12 = arith.constant dense<0.000000e+00> : vector<1x8x8xf32>
    %37 = tpu.matmul %32, %34, %cst_12 {dimension_numbers = #tpu.dot_dimension_numbers<[2], [2], [1], [1], [0, 0, 0, 1, 1, 1], [0], [0]>} : vector<1x8x8xbf16>, vector<1x8x8xbf16>, vector<1x8x8xf32> -> vector<1x8x8xf32>
    "tpu.trace_stop"() : () -> ()
    %cst_13 = arith.constant dense<0xFF800000> : vector<1x8xf32>
    %38 = vector.multi_reduction <maximumf>, %37, %cst_13 [2] : vector<1x8x8xf32> to vector<1x8xf32>
    %39 = vector.shape_cast %38 : vector<1x8xf32> to vector<1x8x1xf32>
    %40 = vector.broadcast %39 : vector<1x8x1xf32> to vector<1x8x8xf32>
    %41 = arith.subf %37, %40 : vector<1x8x8xf32>
    %42 = math.exp %41 : vector<1x8x8xf32>
    %cst_14 = arith.constant dense<0.000000e+00> : vector<1x8xf32>
    %43 = vector.multi_reduction <add>, %42, %cst_14 [2] : vector<1x8x8xf32> to vector<1x8xf32>
    %44 = vector.shape_cast %43 : vector<1x8xf32> to vector<1x8x1xf32>
    %45 = tpu.reciprocal %44 {approx = true} : vector<1x8x1xf32> -> vector<1x8x1xf32>
    %46 = arith.truncf %42 : vector<1x8x8xf32> to vector<1x8x8xbf16>
    "tpu.trace_start"() <{level = 10 : i32, message = "bqk,bkd->bqd"}> : () -> ()
    %cst_15 = arith.constant dense<0.000000e+00> : vector<1x8x8xf32>
    %47 = tpu.matmul %46, %36, %cst_15 {dimension_numbers = #tpu.dot_dimension_numbers<[2], [1], [1], [2], [0, 0, 0, 1, 1, 2], [0], [0]>} : vector<1x8x8xbf16>, vector<1x8x8xbf16>, vector<1x8x8xf32> -> vector<1x8x8xf32>
    "tpu.trace_stop"() : () -> ()
    %48 = vector.broadcast %45 : vector<1x8x1xf32> to vector<1x8x8xf32>
    %49 = arith.mulf %47, %48 : vector<1x8x8xf32>
    %50 = vector.shape_cast %49 : vector<1x8x8xf32> to vector<8x8xf32>
    %51 = arith.truncf %50 : vector<8x8xf32> to vector<8x8xbf16>
    %c0_16 = arith.constant 0 : index
    %c8 = arith.constant 8 : index
    %52 = vector.load %arg7[%c0_16, %c8] : memref<8x32xbf16, #tpu.memory_space<vmem>>, vector<8x8xbf16>
    tpu.vector_store %arg7[%c0_16, %c8], %51 {strides = array<i32>} : memref<8x32xbf16, #tpu.memory_space<vmem>>, vector<8x8xbf16>,
    %53 = vector.extract_strided_slice %8 {offsets = [0, 16], sizes = [8, 8], strides = [1, 1]} : vector<8x96xbf16> to vector<8x8xbf16>
    %54 = vector.shape_cast %53 : vector<8x8xbf16> to vector<1x8x8xbf16>
    %55 = vector.extract_strided_slice %8 {offsets = [0, 48], sizes = [8, 8], strides = [1, 1]} : vector<8x96xbf16> to vector<8x8xbf16>
    %56 = vector.shape_cast %55 : vector<8x8xbf16> to vector<1x8x8xbf16>
    %57 = vector.extract_strided_slice %8 {offsets = [0, 80], sizes = [8, 8], strides = [1, 1]} : vector<8x96xbf16> to vector<8x8xbf16>
    %58 = vector.shape_cast %57 : vector<8x8xbf16> to vector<1x8x8xbf16>
    "tpu.trace_start"() <{level = 10 : i32, message = "bqd,bkd->bqk"}> : () -> ()
    %cst_17 = arith.constant dense<0.000000e+00> : vector<1x8x8xf32>
    %59 = tpu.matmul %54, %56, %cst_17 {dimension_numbers = #tpu.dot_dimension_numbers<[2], [2], [1], [1], [0, 0, 0, 1, 1, 1], [0], [0]>} : vector<1x8x8xbf16>, vector<1x8x8xbf16>, vector<1x8x8xf32> -> vector<1x8x8xf32>
    "tpu.trace_stop"() : () -> ()
    %cst_18 = arith.constant dense<0xFF800000> : vector<1x8xf32>
    %60 = vector.multi_reduction <maximumf>, %59, %cst_18 [2] : vector<1x8x8xf32> to vector<1x8xf32>
    %61 = vector.shape_cast %60 : vector<1x8xf32> to vector<1x8x1xf32>
    %62 = vector.broadcast %61 : vector<1x8x1xf32> to vector<1x8x8xf32>
    %63 = arith.subf %59, %62 : vector<1x8x8xf32>
    %64 = math.exp %63 : vector<1x8x8xf32>
    %cst_19 = arith.constant dense<0.000000e+00> : vector<1x8xf32>
    %65 = vector.multi_reduction <add>, %64, %cst_19 [2] : vector<1x8x8xf32> to vector<1x8xf32>
    %66 = vector.shape_cast %65 : vector<1x8xf32> to vector<1x8x1xf32>
    %67 = tpu.reciprocal %66 {approx = true} : vector<1x8x1xf32> -> vector<1x8x1xf32>
    %68 = arith.truncf %64 : vector<1x8x8xf32> to vector<1x8x8xbf16>
    "tpu.trace_start"() <{level = 10 : i32, message = "bqk,bkd->bqd"}> : () -> ()
    %cst_20 = arith.constant dense<0.000000e+00> : vector<1x8x8xf32>
    %69 = tpu.matmul %68, %58, %cst_20 {dimension_numbers = #tpu.dot_dimension_numbers<[2], [1], [1], [2], [0, 0, 0, 1, 1, 2], [0], [0]>} : vector<1x8x8xbf16>, vector<1x8x8xbf16>, vector<1x8x8xf32> -> vector<1x8x8xf32>
    "tpu.trace_stop"() : () -> ()
    %70 = vector.broadcast %67 : vector<1x8x1xf32> to vector<1x8x8xf32>
    %71 = arith.mulf %69, %70 : vector<1x8x8xf32>
    %72 = vector.shape_cast %71 : vector<1x8x8xf32> to vector<8x8xf32>
    %73 = arith.truncf %72 : vector<8x8xf32> to vector<8x8xbf16>
    %c0_21 = arith.constant 0 : index
    %c16 = arith.constant 16 : index
    %74 = vector.load %arg7[%c0_21, %c16] : memref<8x32xbf16, #tpu.memory_space<vmem>>, vector<8x8xbf16>
    tpu.vector_store %arg7[%c0_21, %c16], %73 {strides = array<i32>} : memref<8x32xbf16, #tpu.memory_space<vmem>>, vector<8x8xbf16>,
    %75 = vector.extract_strided_slice %8 {offsets = [0, 24], sizes = [8, 8], strides = [1, 1]} : vector<8x96xbf16> to vector<8x8xbf16>
    %76 = vector.shape_cast %75 : vector<8x8xbf16> to vector<1x8x8xbf16>
    %77 = vector.extract_strided_slice %8 {offsets = [0, 56], sizes = [8, 8], strides = [1, 1]} : vector<8x96xbf16> to vector<8x8xbf16>
    %78 = vector.shape_cast %77 : vector<8x8xbf16> to vector<1x8x8xbf16>
    %79 = vector.extract_strided_slice %8 {offsets = [0, 88], sizes = [8, 8], strides = [1, 1]} : vector<8x96xbf16> to vector<8x8xbf16>
    %80 = vector.shape_cast %79 : vector<8x8xbf16> to vector<1x8x8xbf16>
    "tpu.trace_start"() <{level = 10 : i32, message = "bqd,bkd->bqk"}> : () -> ()
    %cst_22 = arith.constant dense<0.000000e+00> : vector<1x8x8xf32>
    %81 = tpu.matmul %76, %78, %cst_22 {dimension_numbers = #tpu.dot_dimension_numbers<[2], [2], [1], [1], [0, 0, 0, 1, 1, 1], [0], [0]>} : vector<1x8x8xbf16>, vector<1x8x8xbf16>, vector<1x8x8xf32> -> vector<1x8x8xf32>
    "tpu.trace_stop"() : () -> ()
    %cst_23 = arith.constant dense<0xFF800000> : vector<1x8xf32>
    %82 = vector.multi_reduction <maximumf>, %81, %cst_23 [2] : vector<1x8x8xf32> to vector<1x8xf32>
    %83 = vector.shape_cast %82 : vector<1x8xf32> to vector<1x8x1xf32>
    %84 = vector.broadcast %83 : vector<1x8x1xf32> to vector<1x8x8xf32>
    %85 = arith.subf %81, %84 : vector<1x8x8xf32>
    %86 = math.exp %85 : vector<1x8x8xf32>
    %cst_24 = arith.constant dense<0.000000e+00> : vector<1x8xf32>
    %87 = vector.multi_reduction <add>, %86, %cst_24 [2] : vector<1x8x8xf32> to vector<1x8xf32>
    %88 = vector.shape_cast %87 : vector<1x8xf32> to vector<1x8x1xf32>
    %89 = tpu.reciprocal %88 {approx = true} : vector<1x8x1xf32> -> vector<1x8x1xf32>
    %90 = arith.truncf %86 : vector<1x8x8xf32> to vector<1x8x8xbf16>
    "tpu.trace_start"() <{level = 10 : i32, message = "bqk,bkd->bqd"}> : () -> ()
    %cst_25 = arith.constant dense<0.000000e+00> : vector<1x8x8xf32>
    %91 = tpu.matmul %90, %80, %cst_25 {dimension_numbers = #tpu.dot_dimension_numbers<[2], [1], [1], [2], [0, 0, 0, 1, 1, 2], [0], [0]>} : vector<1x8x8xbf16>, vector<1x8x8xbf16>, vector<1x8x8xf32> -> vector<1x8x8xf32>
    "tpu.trace_stop"() : () -> ()
    %92 = vector.broadcast %89 : vector<1x8x1xf32> to vector<1x8x8xf32>
    %93 = arith.mulf %91, %92 : vector<1x8x8xf32>
    %94 = vector.shape_cast %93 : vector<1x8x8xf32> to vector<8x8xf32>
    %95 = arith.truncf %94 : vector<8x8xf32> to vector<8x8xbf16>
    %c0_26 = arith.constant 0 : index
    %c24 = arith.constant 24 : index
    %96 = vector.load %arg7[%c0_26, %c24] : memref<8x32xbf16, #tpu.memory_space<vmem>>, vector<8x8xbf16>
    tpu.vector_store %arg7[%c0_26, %c24], %95 {strides = array<i32>} : memref<8x32xbf16, #tpu.memory_space<vmem>>, vector<8x8xbf16>,
    %c0_27 = arith.constant 0 : index
    %c0_28 = arith.constant 0 : index
    %97 = vector.load %arg7[%c0_27, %c0_28] : memref<8x32xbf16, #tpu.memory_space<vmem>>, vector<8x32xbf16>
    %c0_29 = arith.constant 0 : index
    %c0_30 = arith.constant 0 : index
    %98 = vector.load %arg4[%c0_29, %c0_30] : memref<32x32xbf16, #tpu.memory_space<vmem>>, vector<32x32xbf16>
    %cst_31 = arith.constant dense<0.000000e+00> : vector<8x32xf32>
    %99 = tpu.matmul %97, %98, %cst_31 {dimension_numbers = #tpu.dot_dimension_numbers<[1], [0], [0], [1], [0, 0, 1, 1], [], []>} : vector<8x32xbf16>, vector<32x32xbf16>, vector<8x32xf32> -> vector<8x32xf32>
    %c0_32 = arith.constant 0 : index
    %c0_33 = arith.constant 0 : index
    %100 = vector.load %arg5[%c0_32, %c0_33] : memref<1x32xf32, #tpu.memory_space<vmem>>, vector<1x32xf32>
    %101 = vector.broadcast %100 : vector<1x32xf32> to vector<8x32xf32>
    %102 = arith.addf %99, %101 : vector<8x32xf32>
    %103 = vector.shape_cast %102 : vector<8x32xf32> to vector<1x8x32xf32>
    %c0_34 = arith.constant 0 : index
    %c0_35 = arith.constant 0 : index
    %c0_36 = arith.constant 0 : index
    %104 = vector.load %arg6[%c0_34, %c0_35, %c0_36] : memref<1x8x32xf32, #tpu.memory_space<vmem>>, vector<1x8x32xf32>
    tpu.vector_store %arg6[%c0_34, %c0_35, %c0_36], %103 {strides = array<i32>} : memref<1x8x32xf32, #tpu.memory_space<vmem>>, vector<1x8x32xf32>,
    return
  }
  func.func @transform_0(%arg0: i32) -> (i32, i32, i32) {
    %c0_i32 = arith.constant 0 : i32
    %c0_i32_0 = arith.constant 0 : i32
    %c0_i32_1 = arith.constant 0 : i32
    return %arg0, %c0_i32, %c0_i32_0 : i32, i32, i32
  }
  func.func @transform_1(%arg0: i32) -> (i32, i32) {
    %c0_i32 = arith.constant 0 : i32
    %c0_i32_0 = arith.constant 0 : i32
    %c0_i32_1 = arith.constant 0 : i32
    return %c0_i32, %c0_i32_0 : i32, i32
  }
  func.func @transform_2(%arg0: i32) -> (i32, i32) {
    %c0_i32 = arith.constant 0 : i32
    %c0_i32_0 = arith.constant 0 : i32
    %c0_i32_1 = arith.constant 0 : i32
    return %c0_i32, %c0_i32_0 : i32, i32
  }
  func.func @transform_3(%arg0: i32) -> (i32, i32) {
    %c0_i32 = arith.constant 0 : i32
    %c0_i32_0 = arith.constant 0 : i32
    %c0_i32_1 = arith.constant 0 : i32
    return %c0_i32, %c0_i32_0 : i32, i32
  }
  func.func @transform_4(%arg0: i32) -> (i32, i32) {
    %c0_i32 = arith.constant 0 : i32
    %c0_i32_0 = arith.constant 0 : i32
    %c0_i32_1 = arith.constant 0 : i32
    return %c0_i32, %c0_i32_0 : i32, i32
  }
  func.func @transform_5(%arg0: i32) -> (i32, i32, i32) {
    %c0_i32 = arith.constant 0 : i32
    %c0_i32_0 = arith.constant 0 : i32
    %c0_i32_1 = arith.constant 0 : i32
    return %arg0, %c0_i32, %c0_i32_0 : i32, i32, i32
  }
}

module attributes {stable_mosaic.version = 11 : i64} {
  func.func @_mha_kernel(%arg0: i32, %arg1: memref<1x8x32xf32, #tpu.memory_space<vmem>>, %arg2: memref<32x96xbf16, #tpu.memory_space<vmem>>, %arg3: memref<1x96xf32, #tpu.memory_space<vmem>>, %arg4: memref<32x32xbf16, #tpu.memory_space<vmem>>, %arg5: memref<1x32xf32, #tpu.memory_space<vmem>>, %arg6: memref<1x8x32xf32, #tpu.memory_space<vmem>>, %arg7: memref<8x32xbf16, #tpu.memory_space<vmem>>) attributes {dimension_semantics = [#tpu.dimension_semantics<parallel>], iteration_bounds = array<i64: 2>, scalar_prefetch = 0 : i64, scratch_operands = 1 : i64, tpu.core_type = #tpu.core_type<tc>, window_params = [{transform_indices = @transform_0, window_bounds = array<i64: 1, 8, 32>}, {pipeline_mode = #tpu.pipeline_mode<synchronous>, transform_indices = @transform_1, window_bounds = array<i64: 32, 96>}, {pipeline_mode = #tpu.pipeline_mode<synchronous>, transform_indices = @transform_2, window_bounds = array<i64: 1, 96>}, {pipeline_mode = #tpu.pipeline_mode<synchronous>, transform_indices = @transform_3, window_bounds = array<i64: 32, 32>}, {pipeline_mode = #tpu.pipeline_mode<synchronous>, transform_indices = @transform_4, window_bounds = array<i64: 1, 32>}, {transform_indices = @transform_5, window_bounds = array<i64: 1, 8, 32>}]} {
    %c0 = arith.constant 0 : index
    %c0_0 = arith.constant 0 : index
    %c0_1 = arith.constant 0 : index
    %0 = vector.load %arg1[%c0, %c0_0, %c0_1] : memref<1x8x32xf32, #tpu.memory_space<vmem>>, vector<1x8x32xf32>
    %1 = vector.shape_cast %0 : vector<1x8x32xf32> to vector<8x32xf32>
    %2 = arith.truncf %1 : vector<8x32xf32> to vector<8x32xbf16>
    %c0_2 = arith.constant 0 : index
    %c0_3 = arith.constant 0 : index
    %3 = vector.load %arg2[%c0_2, %c0_3] : memref<32x96xbf16, #tpu.memory_space<vmem>>, vector<32x96xbf16>
    %cst = arith.constant dense<0.000000e+00> : vector<8x96xf32>
    %4 = tpu.matmul %2, %3, %cst {dimension_numbers = #tpu.dot_dimension_numbers<[1], [0], [0], [1], [0, 0, 1, 1], [], []>} : vector<8x32xbf16>, vector<32x96xbf16>, vector<8x96xf32> -> vector<8x96xf32>
    %c0_4 = arith.constant 0 : index
    %c0_5 = arith.constant 0 : index
    %5 = vector.load %arg3[%c0_4, %c0_5] : memref<1x96xf32, #tpu.memory_space<vmem>>, vector<1x96xf32>
    %6 = vector.broadcast %5 : vector<1x96xf32> to vector<8x96xf32>
    %7 = arith.addf %4, %6 : vector<8x96xf32>
    %8 = arith.truncf %7 : vector<8x96xf32> to vector<8x96xbf16>
    %9 = vector.extract_strided_slice %8 {offsets = [0, 0], sizes = [8, 8], strides = [1, 1]} : vector<8x96xbf16> to vector<8x8xbf16>
    %10 = vector.shape_cast %9 : vector<8x8xbf16> to vector<1x8x8xbf16>
    %11 = vector.extract_strided_slice %8 {offsets = [0, 32], sizes = [8, 8], strides = [1, 1]} : vector<8x96xbf16> to vector<8x8xbf16>
    %12 = vector.shape_cast %11 : vector<8x8xbf16> to vector<1x8x8xbf16>
    %13 = vector.extract_strided_slice %8 {offsets = [0, 64], sizes = [8, 8], strides = [1, 1]} : vector<8x96xbf16> to vector<8x8xbf16>
    %14 = vector.shape_cast %13 : vector<8x8xbf16> to vector<1x8x8xbf16>
    "tpu.trace_start"() <{level = 10 : i32, message = "bqd,bkd->bqk"}> : () -> ()
    %cst_6 = arith.constant dense<0.000000e+00> : vector<1x8x8xf32>
    %15 = tpu.matmul %10, %12, %cst_6 {dimension_numbers = #tpu.dot_dimension_numbers<[2], [2], [1], [1], [0, 0, 0, 1, 1, 1], [0], [0]>} : vector<1x8x8xbf16>, vector<1x8x8xbf16>, vector<1x8x8xf32> -> vector<1x8x8xf32>
    "tpu.trace_stop"() : () -> ()
    %cst_7 = arith.constant dense<0xFF800000> : vector<1x8xf32>
    %16 = vector.multi_reduction <maximumf>, %15, %cst_7 [2] : vector<1x8x8xf32> to vector<1x8xf32>
    %17 = vector.shape_cast %16 : vector<1x8xf32> to vector<1x8x1xf32>
    %18 = vector.broadcast %17 : vector<1x8x1xf32> to vector<1x8x8xf32>
    %19 = arith.subf %15, %18 : vector<1x8x8xf32>
    %20 = math.exp %19 : vector<1x8x8xf32>
    %cst_8 = arith.constant dense<0.000000e+00> : vector<1x8xf32>
    %21 = vector.multi_reduction <add>, %20, %cst_8 [2] : vector<1x8x8xf32> to vector<1x8xf32>
    %22 = vector.shape_cast %21 : vector<1x8xf32> to vector<1x8x1xf32>
    %23 = tpu.reciprocal %22 {approx = true} : vector<1x8x1xf32> -> vector<1x8x1xf32>
    %24 = arith.truncf %20 : vector<1x8x8xf32> to vector<1x8x8xbf16>
    "tpu.trace_start"() <{level = 10 : i32, message = "bqk,bkd->bqd"}> : () -> ()
    %cst_9 = arith.constant dense<0.000000e+00> : vector<1x8x8xf32>
    %25 = tpu.matmul %24, %14, %cst_9 {dimension_numbers = #tpu.dot_dimension_numbers<[2], [1], [1], [2], [0, 0, 0, 1, 1, 2], [0], [0]>} : vector<1x8x8xbf16>, vector<1x8x8xbf16>, vector<1x8x8xf32> -> vector<1x8x8xf32>
    "tpu.trace_stop"() : () -> ()
    %26 = vector.broadcast %23 : vector<1x8x1xf32> to vector<1x8x8xf32>
    %27 = arith.mulf %25, %26 : vector<1x8x8xf32>
    %28 = vector.shape_cast %27 : vector<1x8x8xf32> to vector<8x8xf32>
    %29 = arith.truncf %28 : vector<8x8xf32> to vector<8x8xbf16>
    %c0_10 = arith.constant 0 : index
    %c0_11 = arith.constant 0 : index
    %30 = vector.load %arg7[%c0_10, %c0_11] : memref<8x32xbf16, #tpu.memory_space<vmem>>, vector<8x8xbf16>
    tpu.vector_store %arg7[%c0_10, %c0_11], %29 {strides = array<i32>} : memref<8x32xbf16, #tpu.memory_space<vmem>>, vector<8x8xbf16>,
    %31 = vector.extract_strided_slice %8 {offsets = [0, 8], sizes = [8, 8], strides = [1, 1]} : vector<8x96xbf16> to vector<8x8xbf16>
    %32 = vector.shape_cast %31 : vector<8x8xbf16> to vector<1x8x8xbf16>
    %33 = vector.extract_strided_slice %8 {offsets = [0, 40], sizes = [8, 8], strides = [1, 1]} : vector<8x96xbf16> to vector<8x8xbf16>
    %34 = vector.shape_cast %33 : vector<8x8xbf16> to vector<1x8x8xbf16>
    %35 = vector.extract_strided_slice %8 {offsets = [0, 72], sizes = [8, 8], strides = [1, 1]} : vector<8x96xbf16> to vector<8x8xbf16>
    %36 = vector.shape_cast %35 : vector<8x8xbf16> to vector<1x8x8xbf16>
    "tpu.trace_start"() <{level = 10 : i32, message = "bqd,bkd->bqk"}> : () -> ()
    %cst_12 = arith.constant dense<0.000000e+00> : vector<1x8x8xf32>
    %37 = tpu.matmul %32, %34, %cst_12 {dimension_numbers = #tpu.dot_dimension_numbers<[2], [2], [1], [1], [0, 0, 0, 1, 1, 1], [0], [0]>} : vector<1x8x8xbf16>, vector<1x8x8xbf16>, vector<1x8x8xf32> -> vector<1x8x8xf32>
    "tpu.trace_stop"() : () -> ()
    %cst_13 = arith.constant dense<0xFF800000> : vector<1x8xf32>
    %38 = vector.multi_reduction <maximumf>, %37, %cst_13 [2] : vector<1x8x8xf32> to vector<1x8xf32>
    %39 = vector.shape_cast %38 : vector<1x8xf32> to vector<1x8x1xf32>
    %40 = vector.broadcast %39 : vector<1x8x1xf32> to vector<1x8x8xf32>
    %41 = arith.subf %37, %40 : vector<1x8x8xf32>
    %42 = math.exp %41 : vector<1x8x8xf32>
    %cst_14 = arith.constant dense<0.000000e+00> : vector<1x8xf32>
    %43 = vector.multi_reduction <add>, %42, %cst_14 [2] : vector<1x8x8xf32> to vector<1x8xf32>
    %44 = vector.shape_cast %43 : vector<1x8xf32> to vector<1x8x1xf32>
    %45 = tpu.reciprocal %44 {approx = true} : vector<1x8x1xf32> -> vector<1x8x1xf32>
    %46 = arith.truncf %42 : vector<1x8x8xf32> to vector<1x8x8xbf16>
    "tpu.trace_start"() <{level = 10 : i32, message = "bqk,bkd->bqd"}> : () -> ()
    %cst_15 = arith.constant dense<0.000000e+00> : vector<1x8x8xf32>
    %47 = tpu.matmul %46, %36, %cst_15 {dimension_numbers = #tpu.dot_dimension_numbers<[2], [1], [1], [2], [0, 0, 0, 1, 1, 2], [0], [0]>} : vector<1x8x8xbf16>, vector<1x8x8xbf16>, vector<1x8x8xf32> -> vector<1x8x8xf32>
    "tpu.trace_stop"() : () -> ()
    %48 = vector.broadcast %45 : vector<1x8x1xf32> to vector<1x8x8xf32>
    %49 = arith.mulf %47, %48 : vector<1x8x8xf32>
    %50 = vector.shape_cast %49 : vector<1x8x8xf32> to vector<8x8xf32>
    %51 = arith.truncf %50 : vector<8x8xf32> to vector<8x8xbf16>
    %c0_16 = arith.constant 0 : index
    %c8 = arith.constant 8 : index
    %52 = vector.load %arg7[%c0_16, %c8] : memref<8x32xbf16, #tpu.memory_space<vmem>>, vector<8x8xbf16>
    tpu.vector_store %arg7[%c0_16, %c8], %51 {strides = array<i32>} : memref<8x32xbf16, #tpu.memory_space<vmem>>, vector<8x8xbf16>,
    %53 = vector.extract_strided_slice %8 {offsets = [0, 16], sizes = [8, 8], strides = [1, 1]} : vector<8x96xbf16> to vector<8x8xbf16>
    %54 = vector.shape_cast %53 : vector<8x8xbf16> to vector<1x8x8xbf16>
    %55 = vector.extract_strided_slice %8 {offsets = [0, 48], sizes = [8, 8], strides = [1, 1]} : vector<8x96xbf16> to vector<8x8xbf16>
    %56 = vector.shape_cast %55 : vector<8x8xbf16> to vector<1x8x8xbf16>
    %57 = vector.extract_strided_slice %8 {offsets = [0, 80], sizes = [8, 8], strides = [1, 1]} : vector<8x96xbf16> to vector<8x8xbf16>
    %58 = vector.shape_cast %57 : vector<8x8xbf16> to vector<1x8x8xbf16>
    "tpu.trace_start"() <{level = 10 : i32, message = "bqd,bkd->bqk"}> : () -> ()
    %cst_17 = arith.constant dense<0.000000e+00> : vector<1x8x8xf32>
    %59 = tpu.matmul %54, %56, %cst_17 {dimension_numbers = #tpu.dot_dimension_numbers<[2], [2], [1], [1], [0, 0, 0, 1, 1, 1], [0], [0]>} : vector<1x8x8xbf16>, vector<1x8x8xbf16>, vector<1x8x8xf32> -> vector<1x8x8xf32>
    "tpu.trace_stop"() : () -> ()
    %cst_18 = arith.constant dense<0xFF800000> : vector<1x8xf32>
    %60 = vector.multi_reduction <maximumf>, %59, %cst_18 [2] : vector<1x8x8xf32> to vector<1x8xf32>
    %61 = vector.shape_cast %60 : vector<1x8xf32> to vector<1x8x1xf32>
    %62 = vector.broadcast %61 : vector<1x8x1xf32> to vector<1x8x8xf32>
    %63 = arith.subf %59, %62 : vector<1x8x8xf32>
    %64 = math.exp %63 : vector<1x8x8xf32>
    %cst_19 = arith.constant dense<0.000000e+00> : vector<1x8xf32>
    %65 = vector.multi_reduction <add>, %64, %cst_19 [2] : vector<1x8x8xf32> to vector<1x8xf32>
    %66 = vector.shape_cast %65 : vector<1x8xf32> to vector<1x8x1xf32>
    %67 = tpu.reciprocal %66 {approx = true} : vector<1x8x1xf32> -> vector<1x8x1xf32>
    %68 = arith.truncf %64 : vector<1x8x8xf32> to vector<1x8x8xbf16>
    "tpu.trace_start"() <{level = 10 : i32, message = "bqk,bkd->bqd"}> : () -> ()
    %cst_20 = arith.constant dense<0.000000e+00> : vector<1x8x8xf32>
    %69 = tpu.matmul %68, %58, %cst_20 {dimension_numbers = #tpu.dot_dimension_numbers<[2], [1], [1], [2], [0, 0, 0, 1, 1, 2], [0], [0]>} : vector<1x8x8xbf16>, vector<1x8x8xbf16>, vector<1x8x8xf32> -> vector<1x8x8xf32>
    "tpu.trace_stop"() : () -> ()
    %70 = vector.broadcast %67 : vector<1x8x1xf32> to vector<1x8x8xf32>
    %71 = arith.mulf %69, %70 : vector<1x8x8xf32>
    %72 = vector.shape_cast %71 : vector<1x8x8xf32> to vector<8x8xf32>
    %73 = arith.truncf %72 : vector<8x8xf32> to vector<8x8xbf16>
    %c0_21 = arith.constant 0 : index
    %c16 = arith.constant 16 : index
    %74 = vector.load %arg7[%c0_21, %c16] : memref<8x32xbf16, #tpu.memory_space<vmem>>, vector<8x8xbf16>
    tpu.vector_store %arg7[%c0_21, %c16], %73 {strides = array<i32>} : memref<8x32xbf16, #tpu.memory_space<vmem>>, vector<8x8xbf16>,
    %75 = vector.extract_strided_slice %8 {offsets = [0, 24], sizes = [8, 8], strides = [1, 1]} : vector<8x96xbf16> to vector<8x8xbf16>
    %76 = vector.shape_cast %75 : vector<8x8xbf16> to vector<1x8x8xbf16>
    %77 = vector.extract_strided_slice %8 {offsets = [0, 56], sizes = [8, 8], strides = [1, 1]} : vector<8x96xbf16> to vector<8x8xbf16>
    %78 = vector.shape_cast %77 : vector<8x8xbf16> to vector<1x8x8xbf16>
    %79 = vector.extract_strided_slice %8 {offsets = [0, 88], sizes = [8, 8], strides = [1, 1]} : vector<8x96xbf16> to vector<8x8xbf16>
    %80 = vector.shape_cast %79 : vector<8x8xbf16> to vector<1x8x8xbf16>
    "tpu.trace_start"() <{level = 10 : i32, message = "bqd,bkd->bqk"}> : () -> ()
    %cst_22 = arith.constant dense<0.000000e+00> : vector<1x8x8xf32>
    %81 = tpu.matmul %76, %78, %cst_22 {dimension_numbers = #tpu.dot_dimension_numbers<[2], [2], [1], [1], [0, 0, 0, 1, 1, 1], [0], [0]>} : vector<1x8x8xbf16>, vector<1x8x8xbf16>, vector<1x8x8xf32> -> vector<1x8x8xf32>
    "tpu.trace_stop"() : () -> ()
    %cst_23 = arith.constant dense<0xFF800000> : vector<1x8xf32>
    %82 = vector.multi_reduction <maximumf>, %81, %cst_23 [2] : vector<1x8x8xf32> to vector<1x8xf32>
    %83 = vector.shape_cast %82 : vector<1x8xf32> to vector<1x8x1xf32>
    %84 = vector.broadcast %83 : vector<1x8x1xf32> to vector<1x8x8xf32>
    %85 = arith.subf %81, %84 : vector<1x8x8xf32>
    %86 = math.exp %85 : vector<1x8x8xf32>
    %cst_24 = arith.constant dense<0.000000e+00> : vector<1x8xf32>
    %87 = vector.multi_reduction <add>, %86, %cst_24 [2] : vector<1x8x8xf32> to vector<1x8xf32>
    %88 = vector.shape_cast %87 : vector<1x8xf32> to vector<1x8x1xf32>
    %89 = tpu.reciprocal %88 {approx = true} : vector<1x8x1xf32> -> vector<1x8x1xf32>
    %90 = arith.truncf %86 : vector<1x8x8xf32> to vector<1x8x8xbf16>
    "tpu.trace_start"() <{level = 10 : i32, message = "bqk,bkd->bqd"}> : () -> ()
    %cst_25 = arith.constant dense<0.000000e+00> : vector<1x8x8xf32>
    %91 = tpu.matmul %90, %80, %cst_25 {dimension_numbers = #tpu.dot_dimension_numbers<[2], [1], [1], [2], [0, 0, 0, 1, 1, 2], [0], [0]>} : vector<1x8x8xbf16>, vector<1x8x8xbf16>, vector<1x8x8xf32> -> vector<1x8x8xf32>
    "tpu.trace_stop"() : () -> ()
    %92 = vector.broadcast %89 : vector<1x8x1xf32> to vector<1x8x8xf32>
    %93 = arith.mulf %91, %92 : vector<1x8x8xf32>
    %94 = vector.shape_cast %93 : vector<1x8x8xf32> to vector<8x8xf32>
    %95 = arith.truncf %94 : vector<8x8xf32> to vector<8x8xbf16>
    %c0_26 = arith.constant 0 : index
    %c24 = arith.constant 24 : index
    %96 = vector.load %arg7[%c0_26, %c24] : memref<8x32xbf16, #tpu.memory_space<vmem>>, vector<8x8xbf16>
    tpu.vector_store %arg7[%c0_26, %c24], %95 {strides = array<i32>} : memref<8x32xbf16, #tpu.memory_space<vmem>>, vector<8x8xbf16>,
    %c0_27 = arith.constant 0 : index
    %c0_28 = arith.constant 0 : index
    %97 = vector.load %arg7[%c0_27, %c0_28] : memref<8x32xbf16, #tpu.memory_space<vmem>>, vector<8x32xbf16>
    %c0_29 = arith.constant 0 : index
    %c0_30 = arith.constant 0 : index
    %98 = vector.load %arg4[%c0_29, %c0_30] : memref<32x32xbf16, #tpu.memory_space<vmem>>, vector<32x32xbf16>
    %cst_31 = arith.constant dense<0.000000e+00> : vector<8x32xf32>
    %99 = tpu.matmul %97, %98, %cst_31 {dimension_numbers = #tpu.dot_dimension_numbers<[1], [0], [0], [1], [0, 0, 1, 1], [], []>} : vector<8x32xbf16>, vector<32x32xbf16>, vector<8x32xf32> -> vector<8x32xf32>
    %c0_32 = arith.constant 0 : index
    %c0_33 = arith.constant 0 : index
    %100 = vector.load %arg5[%c0_32, %c0_33] : memref<1x32xf32, #tpu.memory_space<vmem>>, vector<1x32xf32>
    %101 = vector.broadcast %100 : vector<1x32xf32> to vector<8x32xf32>
    %102 = arith.addf %99, %101 : vector<8x32xf32>
    %103 = vector.shape_cast %102 : vector<8x32xf32> to vector<1x8x32xf32>
    %c0_34 = arith.constant 0 : index
    %c0_35 = arith.constant 0 : index
    %c0_36 = arith.constant 0 : index
    %104 = vector.load %arg6[%c0_34, %c0_35, %c0_36] : memref<1x8x32xf32, #tpu.memory_space<vmem>>, vector<1x8x32xf32>
    tpu.vector_store %arg6[%c0_34, %c0_35, %c0_36], %103 {strides = array<i32>} : memref<1x8x32xf32, #tpu.memory_space<vmem>>, vector<1x8x32xf32>,
    return
  }
  func.func @transform_0(%arg0: i32) -> (i32, i32, i32) {
    %c0_i32 = arith.constant 0 : i32
    %c0_i32_0 = arith.constant 0 : i32
    %c0_i32_1 = arith.constant 0 : i32
    return %arg0, %c0_i32, %c0_i32_0 : i32, i32, i32
  }
  func.func @transform_1(%arg0: i32) -> (i32, i32) {
    %c0_i32 = arith.constant 0 : i32
    %c0_i32_0 = arith.constant 0 : i32
    %c0_i32_1 = arith.constant 0 : i32
    return %c0_i32, %c0_i32_0 : i32, i32
  }
  func.func @transform_2(%arg0: i32) -> (i32, i32) {
    %c0_i32 = arith.constant 0 : i32
    %c0_i32_0 = arith.constant 0 : i32
    %c0_i32_1 = arith.constant 0 : i32
    return %c0_i32, %c0_i32_0 : i32, i32
  }
  func.func @transform_3(%arg0: i32) -> (i32, i32) {
    %c0_i32 = arith.constant 0 : i32
    %c0_i32_0 = arith.constant 0 : i32
    %c0_i32_1 = arith.constant 0 : i32
    return %c0_i32, %c0_i32_0 : i32, i32
  }
  func.func @transform_4(%arg0: i32) -> (i32, i32) {
    %c0_i32 = arith.constant 0 : i32
    %c0_i32_0 = arith.constant 0 : i32
    %c0_i32_1 = arith.constant 0 : i32
    return %c0_i32, %c0_i32_0 : i32, i32
  }
  func.func @transform_5(%arg0: i32) -> (i32, i32, i32) {
    %c0_i32 = arith.constant 0 : i32
    %c0_i32_0 = arith.constant 0 : i32
    %c0_i32_1 = arith.constant 0 : i32
    return %arg0, %c0_i32, %c0_i32_0 : i32, i32, i32
  }
}

</mosaic_0001>

<bundles_post_ra>
// kernel: tpu_custom_call.1
= control target key start
LH: loop header
LB: loop body
LE: loop exit
PB: predicated region body
PF: predicated region fallthrough
CT: control target
= control target key end

     0   :  { %10 = vsyncpa [#allocation4], 0  ;;  %s1909_s0 = inlined_call_operand.hbm [shape: f32[2,8,32], index: 0, kind: input, shape index: {}]   ;;  %s1910_s1 = inlined_call_operand.hbm [shape: bf16[32,96], index: 1, kind: input, shape index: {}]   ;;  %s1911_s2 = inlined_call_operand.hbm [shape: f32[1,96], index: 2, kind: input, shape index: {}]   ;;  %s1912_s3 = inlined_call_operand.hbm [shape: bf16[32,32], index: 3, kind: input, shape index: {}]   ;;  %s1913_s4 = inlined_call_operand.hbm [shape: f32[1,32], index: 4, kind: input, shape index: {}]   ;;  %s1914_s5 = inlined_call_operand.hbm [shape: f32[2,8,32], index: 5, kind: output, shape index: {}]  }
   0x1   :  { %12 = vsyncpa [#allocation4 + $0x1], 0 }
   0x2   :  { %13 = vsyncpa [#allocation7], 0 }
   0x3   :  { %14 = vsyncpa [#allocation10], 0 }
   0x4   :  { %15 = vsyncpa [#allocation5], 0 }
   0x5   :  { %17 = vsyncpa [#allocation5 + $0x1], 0  ;;  %s1551_s18 = smov 0   ;;  %s1553_s19 = smov 0  }
   0x6   :  { %s1555_s20 = smov 0   ;;  %s1557_s21 = smov 0  }
   0x7 LB: > { %s1497_s22 = smov [#allocation6]   ;;  %s1572_s24 = sadd.s32 4294967295, %s1495_s21   ;;  %s1495_s21 = sphi %s1557_s21, %s1938_s21   ;;  %s1491_s20 = sphi %s1555_s20, %s1937_s20   ;;  %s1487_s19 = sphi %s1553_s19, %s1936_s19   ;;  %s1483_s18 = sphi %s1551_s18, %s1935_s18  }
   0x8   : > { %s176_s23 = sshll.u32 %s1497_s22, 4  ;;  %p1027_p0 = scmp.ge.s32.totalorder %s1495_s21, 1  ;;  %s1577_s23 = int_to_ptr.vmem [resolvable:$true] %s176_s23 }
   0x9   : > { %p1915_p1 = scmp.eq.s32.totalorder %s1572_s24, 0  ;;  %p164_p2 = scmp.lt.s32.totalorder %s1495_s21, 3 }
   0xa   : > { %s1498_s26 = smov [#allocation9]   ;;  %s1499_s29 = smov [#allocation8]  }
   0xb   : > { %p1579_p3 = pnand %p1027_p0, %p164_p2  ;;  %s200_s27 = sshll.u32 %s1498_s26, 4  ;;  %s1592_s27 = int_to_ptr.vmem [resolvable:$true] %s200_s27 }
   0xc   : > { %s190_s30 = sshll.u32 %s1499_s29, 4  ;;  %s1279_s8 = scalar_lea.hbm %s1910_s1, 256  ;;  %s1594_s30 = int_to_ptr.vmem [resolvable:$true] %s190_s30 }
   0xd   : > { %s1918_s25 = scalar_select %p1579_p3, 1, 0 }
   0xe   : > { %p1174_p5 = pneg %p1579_p3  ;;  %p1280_p7 = scmp.ne.s32.totalorder %s1910_s1, %s1279_s8 }
   0xf   : > { %p1286_p11 = scmp.lt.u32.totalorder %s1279_s8, %s1910_s1 }
  0x10   : > { %p1588_p6 = pnand %p1174_p5, %p1915_p1 }
  0x12   : > { %p1604_p8 = pneg %p1588_p6 }
  0x14   : > { %p1282_p9 = pnand %p1604_p8, %p1280_p7 }
  0x16   : > { %p1283_p10 = pneg %p1282_p9 }
  0x18   : > { %p1288_p12 = pnand %p1286_p11, %p1283_p10 }
  0x1a   : > { %1291 = shalt.err (!%p1288_p12)
}
  0x1b   : > { %s1292_s14 = scalar_lea.vmem %s1577_s23, 256  ;;  %p1300_p5 = scmp.lt.s32.totalorder %s1577_s23, %s1577_s23 }
  0x1c   : > { %p1293_p13 = scmp.ne.s32.totalorder %s1577_s23, %s1292_s14  ;;  %p1301_p4 = scmp.lt.s32.totalorder %s1292_s14, %s1292_s14 }
  0x1e   : > { %p1295_p0 = pnand %p1293_p13, %p1604_p8  ;;  %p1302_p7 = por %p1301_p4, %p1300_p5 }
  0x20   : > { %p1296_p2 = pneg %p1295_p0 }
  0x22   : > { %p1303_p9 = pnand %p1302_p7, %p1296_p2 }
  0x24   : > { %1306 = shalt.err (!%p1303_p9)
}
  0x25   : > { %s1500_s15 = smov 64   ;;  %s1501_s16 = smov 4  }
  0x26   : > { %1177 = dma.hbm_to_vmem [thread:$0]  (!%p1588_p6), %s1910_s1, 256, %s1577_s23, [#allocation7], %s1500_s15, %s1500_s15, %s1501_s16  }
  0x27   : > { %s1307_s6 = scalar_lea.hbm %s1912_s3, 256 }
  0x28   : > { %p1308_p4 = scmp.ne.s32.totalorder %s1912_s3, %s1307_s6  ;;  %p1314_p12 = scmp.lt.u32.totalorder %s1307_s6, %s1912_s3 }
  0x2a   : > { %p1310_p10 = pnand %p1308_p4, %p1604_p8 }
  0x2c   : > { %p1311_p11 = pneg %p1310_p10 }
  0x2e   : > { %p1316_p13 = pnand %p1314_p12, %p1311_p11 }
  0x30   : > { %1319 = shalt.err (!%p1316_p13)
}
  0x31   : > { %s1320_s23 = scalar_lea.vmem %s1592_s27, 256  ;;  %p1328_p7 = scmp.lt.s32.totalorder %s1592_s27, %s1592_s27 }
  0x32   : > { %p1321_p0 = scmp.ne.s32.totalorder %s1592_s27, %s1320_s23  ;;  %p1329_p9 = scmp.lt.s32.totalorder %s1320_s23, %s1320_s23 }
  0x34   : > { %p1323_p2 = pnand %p1321_p0, %p1604_p8  ;;  %p1330_p4 = por %p1329_p9, %p1328_p7 }
  0x36   : > { %p1324_p5 = pneg %p1323_p2 }
  0x38   : > { %p1331_p10 = pnand %p1330_p4, %p1324_p5 }
  0x3a   : > { %1334 = shalt.err (!%p1331_p10)
}
  0x3b   : > { %1183 = dma.hbm_to_vmem [thread:$0]  (!%p1588_p6), %s1912_s3, 256, %s1592_s27, [#allocation10], %s1500_s15, %s1500_s15, %s1501_s16  }
  0x3c   : > { %s1335_s22 = scalar_lea.hbm %s1911_s2, 16 }
  0x3d   : > { %p1336_p11 = scmp.ne.s32.totalorder %s1911_s2, %s1335_s22  ;;  %p1342_p0 = scmp.lt.u32.totalorder %s1335_s22, %s1911_s2 }
  0x3f   : > { %p1338_p12 = pnand %p1336_p11, %p1604_p8 }
  0x41   : > { %p1339_p13 = pneg %p1338_p12 }
  0x43   : > { %p1344_p2 = pnand %p1342_p0, %p1339_p13 }
  0x45   : > { %1347 = shalt.err (!%p1344_p2)
}
  0x46   : > { %s1348_s27 = scalar_lea.vmem %s1594_s30, 16  ;;  %s1355_s15 = scalar_lea.vmem %s1594_s30, 32 }
  0x47   : > { %p1349_p5 = scmp.ne.s32.totalorder %s1594_s30, %s1348_s27  ;;  %p1356_p4 = scmp.lt.s32.totalorder %s1594_s30, %s1594_s30 }
  0x48   : > { %p1357_p10 = scmp.lt.s32.totalorder %s1355_s15, %s1348_s27 }
  0x49   : > { %p1351_p7 = pnand %p1349_p5, %p1604_p8 }
  0x4a   : > { %p1358_p11 = por %p1357_p10, %p1356_p4 }
  0x4b   : > { %p1352_p9 = pneg %p1351_p7 }
  0x4d   : > { %p1359_p12 = pnand %p1358_p11, %p1352_p9 }
  0x4f   : > { %1362 = shalt.err (!%p1359_p12)
}
  0x50   : > { %1180 = dma.hbm_to_vmem [thread:$0]  (!%p1588_p6), %s1911_s2, 16, %s1594_s30, [#allocation7]  }
  0x51   : > { %s1502_s9 = smov [#allocation11]   ;;  %s1363_s13 = scalar_lea.hbm %s1913_s4, 16 }
  0x52   : > { %s214_s10 = sshll.u32 %s1502_s9, 4  ;;  %p1364_p13 = scmp.ne.s32.totalorder %s1913_s4, %s1363_s13  ;;  %s215_s10 = int_to_ptr.vmem [resolvable:$true] %s214_s10 }
  0x53   : > { %p1370_p5 = scmp.lt.u32.totalorder %s1363_s13, %s1913_s4 }
  0x54   : > { %p1366_p0 = pnand %p1364_p13, %p1604_p8 }
  0x56   : > { %p1367_p2 = pneg %p1366_p0 }
  0x58   : > { %p1372_p7 = pnand %p1370_p5, %p1367_p2 }
  0x5a   : > { %1375 = shalt.err (!%p1372_p7)
}
  0x5b   : > { %s1376_s30 = scalar_lea.vmem %s215_s10, 16  ;;  %s1383_s29 = scalar_lea.vmem %s215_s10, 32 }
  0x5c   : > { %p1377_p9 = scmp.ne.s32.totalorder %s215_s10, %s1376_s30  ;;  %p1384_p11 = scmp.lt.s32.totalorder %s215_s10, %s215_s10 }
  0x5d   : > { %p1385_p12 = scmp.lt.s32.totalorder %s1383_s29, %s1376_s30 }
  0x5e   : > { %p1379_p4 = pnand %p1377_p9, %p1604_p8 }
  0x5f   : > { %p1386_p1 = por %p1385_p12, %p1384_p11 }
  0x60   : > { %p1380_p10 = pneg %p1379_p4 }
  0x62   : > { %p1387_p3 = pnand %p1386_p1, %p1380_p10 }
  0x64   : > { %1390 = shalt.err (!%p1387_p3)
}
  0x65   : > { %1186 = dma.hbm_to_vmem [thread:$0]  (!%p1588_p6), %s1913_s4, 16, %s215_s10, [#allocation10]  }
  0x66   : > { %s1026_s11 = sadd.s32 4294967294, %s1495_s21   ;;  %s1692_s28 = sadd.s32 1, %s1495_s21  }
  0x67   : > { %s27_s27 = ssub.s32 %s1495_s21, %s1692_s28  ;;  %s30_s15 = sadd.s32 1, %s1491_s20 }
  0x68   : > { %p28_p1 = scmp.eq.s32.totalorder %s27_s27, 0  ;;  %p37_p3 = scmp.ne.s32.totalorder %s1491_s20, %s1487_s19 }
  0x69   : > { %p38_p8 = scmp.eq.s32.totalorder %s1495_s21, 0  ;;  %p43_p13 = scmp.ne.s32.totalorder %s1487_s19, %s1483_s18 }
  0x6a   : > { %s1703_s16 = scalar_select %p28_p1, %s1491_s20, %s30_s15  }
  0x6b   : > { %p1705_p0 = por %p38_p8, %p37_p3  ;;  %p1922_p2 = scmp.eq.s32.totalorder %s1572_s24, 0 }
  0x6c   : > { %p151_p5 = scmp.eq.s32.totalorder %s1572_s24, 1  ;;  %p157_p7 = scmp.eq.s32.totalorder %s1026_s11, 1 }
  0x6d   : > { %p1711_p6 = por %p1922_p2, %p43_p13  ;;  %p1199_p9 = scmp.lt.s32.totalorder %s1495_s21, 2 }
  0x6e   : > { %s225_s10 = sand.u32 1, %s1491_s20   ;;  %p1718_p4 = por %p151_p5, %p37_p3 }
  0x6f   : > { %p1722_p10 = por %p157_p7, %p43_p13  ;;  %s1033_s13 = sshll.u32 %s225_s10, 3 }
  0x70   : > { %s1924_s23 = scalar_select %p1718_p4, 1, 0 }
  0x71   : > { %s1925_s12 = scalar_select %p1722_p10, 1, 0 }
  0x72   : > { %s1034_s14 = sshll.u32 %s1495_s21, 7  ;;  %s229_s30 = scalar_lea.vmem [#allocation3], %s1033_s13 }
  0x73   : > { %s1730_s26 = scalar_lea.hbm %s1909_s0, %s1034_s14  ;;  %s236_s29 = sshll.u32 %s229_s30, 4  ;;  %s1732_s29 = int_to_ptr.vmem [resolvable:$true] %s236_s29 }
  0x74   : > { %p1736_p11 = pnand %p1199_p9, %p1705_p0  ;;  %s226_s7 = scalar_lea.sflag [#allocation4], %s225_s10 }
  0x75   : > { %s1391_s11 = scalar_lea.hbm %s1730_s26, 128  ;;  %s1396_s13 = scalar_lea.hbm %s1909_s0, 256 }
  0x76   : > { %p1392_p12 = scmp.ne.s32.totalorder %s1730_s26, %s1391_s11  ;;  %p1393_p1 = pneg %p1736_p11 }
  0x77   : > { %p1397_p13 = scmp.lt.u32.totalorder %s1730_s26, %s1909_s0  ;;  %p1398_p0 = scmp.lt.u32.totalorder %s1396_s13, %s1391_s11 }
  0x78   : > { %p1394_p3 = pnand %p1393_p1, %p1392_p12  ;;  %p1400_p5 = scmp.lt.u32.totalorder %s1391_s11, %s1730_s26 }
  0x79   : > { %p1399_p2 = por %p1398_p0, %p1397_p13 }
  0x7a   : > { %p1395_p8 = pneg %p1394_p3 }
  0x7b   : > { %p1401_p7 = por %p1400_p5, %p1399_p2 }
  0x7d   : > { %p1402_p9 = pnand %p1401_p7, %p1395_p8 }
  0x7f   : > { %1405 = shalt.err (!%p1402_p9)
}
  0x80   : > { %s1406_s10 = scalar_lea.vmem %s1732_s29, 128  ;;  %s1503_s17 = smov [#allocation3]  }
  0x81   : > { %p1407_p12 = scmp.ne.s32.totalorder %s1732_s29, %s1406_s10  ;;  %s1411_s22 = sshll.u32 %s1503_s17, 4  ;;  %s1412_s22 = int_to_ptr.vmem [resolvable:$false] %s1411_s22 }
  0x82   : > { %s1413_s30 = scalar_lea.vmem %s1412_s22, 256  ;;  %p1414_p4 = scmp.lt.s32.totalorder %s1732_s29, %s1412_s22 }
  0x83   : > { %p1409_p3 = pnand %p1407_p12, %p1393_p1  ;;  %p1415_p13 = scmp.lt.s32.totalorder %s1413_s30, %s1406_s10 }
  0x85   : > { %p1410_p10 = pneg %p1409_p3  ;;  %p1416_p0 = por %p1415_p13, %p1414_p4 }
  0x87   : > { %p1417_p2 = pnand %p1416_p0, %p1410_p10 }
  0x89   : > { %1420 = shalt.err (!%p1417_p2)
}
  0x8a   : > { %1190 = dma.hbm_to_vmem [thread:$0]  (!%p1736_p11), %s1730_s26, 128, %s1732_s29, %s226_s7  }
  0x8b   : > { %p1927_p8 = scmp.ne.s32.totalorder %s1918_s25, 0 }
  0x8c   : > { %s1768_s11 = sand.u32 (!%p1927_p8), 1, %s1487_s19  }
  0x8d   : > { %245 = sbr.rel (%p1927_p8) target bundleno = 1496 (0x5d8), region = 40  ;;  %s1036_s27 = sshll.u32 (!%p1927_p8), %s1768_s11, 3 }
  0x8e   : > { %s248_s15 = scalar_lea.sflag (!%p1927_p8), [#allocation4], %s1768_s11  ;;  %s251_s13 = scalar_lea.vmem (!%p1927_p8), [#allocation3], %s1036_s27 }
  0x94   : > { %1466 = dma.done.wait (%p1711_p6), %s248_s15, 128  }
  0x95   : > { %1468 = vsyncadd (%p1711_p6), %s248_s15, 4294967168  ;;  %p1928_p4 = scmp.eq.s32.totalorder %s1572_s24, 0 }
  0x97   : > { %1470 = dma.done.wait (%p1928_p4), [#allocation7], 272   ;;  %p1929_p10 = pmov %p1928_p4 }
  0x98   : > { %p1930_p11 = pmov %p1928_p4 }
  0x99   : > { %1472 = vsyncadd (%p1929_p10), [#allocation7], 4294967024 }
  0x9a   : > { %1474 = dma.done.wait (%p1930_p11), [#allocation10], 272   ;;  %p1931_p1 = pmov %p1928_p4 }
  0x9b   : > { %v1504_v0 = vmov 0.0   ;;  %vm1505_vm0 = vmmov 0   ;;  %v1259_v1 = vld [vmem:[#allocation6] sm:$0xff]   ;;  %v1260_v2 = vld [vmem:[#allocation6 + $0x8] sm:$0xff]   ;;  %v295_v3 = vld [vmem:[%s251_s13] sm:$0xff]  ;;  %vm320_vm1 = vcmask 261120  }
  0x9c   : > { %1476 = vsyncadd (%p1931_p1), [#allocation10], 4294967024  ;;  %1090 = vmatprep.subr.bf16.mxu0 %v1504_v0  ;;  %1094 = vmatprep.mubr.msk.bf16.mxu0 %vm1505_vm0, %v1504_v0  ;;  %v296_v4 = vpack.c.bf16 %v295_v3, %v295_v3  ;;  %v1042_v5 = vld [vmem:[#allocation8] ss:$0 sm:$0xff]  ;;  %s1506_s25 = smov 120   ;;  %s1507_s9 = smov 96  }
  0x9d   : > { %1098 = vmatprep.subr.bf16.mxu1 %v1504_v0  ;;  %1100 = vmatprep.mubr.msk.bf16.mxu1 %vm1505_vm0, %v1504_v0  ;;  %s1508_s26 = smov 80   ;;  %s1509_s29 = smov 88   ;;  %vm368_vm2 = vcmask 64512   ;;  %vm431_vm3 = vcmask 1043456   ;;  %vm477_vm4 = vcmask 60416   ;;  %vm596_vm5 = vcmask 126016  }
  0x9e   : > { %1091 = vmatpush3.bf16.msra.mxu0 %v1259_v1  ;;  %s1510_s6 = smov 72   ;;  %s1511_s7 = smov 112   ;;  %vm715_vm6 = vcmask 191616   ;;  %vm834_vm7 = vcmask 257216  }
  0x9f   : > { %1092 = vmatprep.subr.bf16.mxu0 %v1504_v0  ;;  %s1512_s8 = smov 104   ;;  %s1513_s14 = smov 56  }
  0xa0   : > { %s1514_s10 = smov 64   ;;  %s1515_s17 = smov 40  }
  0xa1   : > { %s1516_s22 = smov 48   ;;  %s1517_s30 = smov 8  }
  0xa2   : > { %1093 = vmatpush3.bf16.msra.mxu0 %v1260_v2  ;;  %s1518_s15 = smov 16   ;;  %s1519_s13 = smov 24  }
  0xa3   : > { %1104 = vmatprep.subr.bf16.mxu0 %v1504_v0  ;;  %p1932_p5 = scmp.ne.s32.totalorder %s1924_s23, 0 }
  0xa5   : > { %1095 = vmatmul.mubr.msk.bf16.vlgmr.msra.gmra.mrb[0].mxu0 %vm320_vm1, %v296_v4 }
  0xa6   : > { %1106 = vmatprep.mubr.msk.bf16.mxu0 %vm1505_vm0, %v1504_v0 }
 0x178   : > { %v358_v6 = vpop.f32.mrb[0].mxu0 }
 0x179   : > { %v359_v7 = vadd.f32 %v1042_v5, %v358_v6  ;;  %v1096_v8 = vpop.f32.mrb[1].mxu0 }
 0x17a   : > { %v361_v9 = vpop.f32.mrb[2].mxu0 }
 0x17b   : > { %v1797_v10 = vpack.c.bf16 %v359_v7, %v359_v7  ;;  %v1097_v11 = vpop.f32.mrb[3].mxu0 }
 0x17d   : > { %479 = vrot.lane.b32.xlu1 %v1797_v10, %s1506_s25  ;;  %366 = vrot.lane.b32.xlu0 %v1797_v10, %s1507_s9  ;;  %s1062_s25 = sshll.u32 %s1572_s24, 7  ;;  %s293_s9 = scalar_lea.vmem [#allocation12], %s1036_s27 }
 0x17e   : > { %s905_s24 = scalar_lea.sflag [#allocation5], %s1768_s11 }
 0x181   : > { %600 = vrot.lane.b32.xlu1 %v1797_v10, %s1508_s26  ;;  %481 = vrot.lane.b32.xlu0 %v1797_v10, %s1509_s29  ;;  %s918_s26 = sshll.u32 %s293_s9, 4  ;;  %s1866_s26 = int_to_ptr.vmem [resolvable:$true] %s918_s26 }
 0x182   : > { %s1421_s27 = scalar_lea.vmem %s1866_s26, 128 }
 0x183   : > { %p1422_p6 = scmp.ne.s32.totalorder %s1866_s26, %s1421_s27 }
 0x185   : > { %719 = vrot.lane.b32.xlu1 %v1797_v10, %s1510_s6  ;;  %598 = vrot.lane.b32.xlu0 %v1797_v10, %s1511_s7  ;;  %s1864_s7 = scalar_lea.hbm %s1914_s5, %s1062_s25  ;;  %p1423_p7 = pnand %p1422_p6, %p1932_p5 }
 0x187   : > { %p1424_p9 = pneg %p1423_p7 }
 0x189   : > { %717 = vrot.lane.b32.xlu0 %v1797_v10, %s1512_s8  ;;  %s1520_s8 = smov [#allocation12]  }
 0x1ef   : > { %v367_v12 = vpop.permute.xlu0 %366  ;;  %v480_v15 = vpop.permute.xlu1 %479 }
 0x1f0   : > { %v373_v13 = vsel %vm368_vm2, %v367_v12, 0 }
 0x1f1   : > { %1099 = vmatpush3.bf16.xpose.msra.mxu1 %v373_v13 }
 0x1f2   : > { %1110 = vmatprep.subr.bf16.mxu1 %v1504_v0 }
 0x1f3   : > { %v482_v14 = vpop.permute.xlu0 %481  ;;  %v601_v17 = vpop.permute.xlu1 %600 }
 0x1f4   : > { %v487_v16 = vsel %vm368_vm2, %v482_v14, 0  ;;  %v606_v18 = vsel %vm368_vm2, %v601_v17, 0 }
 0x1f7   : > { %v720_v19 = vpop.permute.xlu1 %719  ;;  %v599_v20 = vpop.permute.xlu0 %598 }
 0x1f8   : > { %1101 = vmatmul.mubr.msk.bf16.vlgmr.msra.gmra.mrb[0].mxu1 %vm368_vm2, %v1797_v10  ;;  %v725_v21 = vsel %vm368_vm2, %v720_v19, 0 }
 0x1f9   : > { %1111 = vmatpush3.bf16.xpose.msra.mxu1 %v487_v16  ;;  %1112 = vmatprep.mubr.msk.bf16.mxu1 %vm1505_vm0, %v1504_v0 }
 0x1fa   : > { %1122 = vmatprep.subr.bf16.mxu1 %v1504_v0 }
 0x1fb   : > { %v718_v22 = vpop.permute.xlu0 %717 }
 0x200   : > { %1113 = vmatmul.mubr.msk.bf16.vlgmr.msra.gmra.mrb[4].mxu1 %vm368_vm2, %v480_v15 }
 0x201   : > { %1123 = vmatpush3.bf16.xpose.msra.mxu1 %v606_v18  ;;  %1124 = vmatprep.mubr.msk.bf16.mxu1 %vm1505_vm0, %v1504_v0 }
 0x202   : > { %1134 = vmatprep.subr.bf16.mxu1 %v1504_v0 }
 0x208   : > { %1125 = vmatmul.mubr.msk.bf16.vlgmr.msra.gmra.mrb[8].mxu1 %vm368_vm2, %v599_v20 }
 0x209   : > { %1135 = vmatpush3.bf16.xpose.msra.mxu1 %v725_v21  ;;  %1136 = vmatprep.mubr.msk.bf16.mxu1 %vm1505_vm0, %v1504_v0 }
 0x20a   : > { %1146 = vmatprep.subr.bf16.mxu1 %v1504_v0 }
 0x210   : > { %1137 = vmatmul.mubr.msk.bf16.vlgmr.msra.gmra.mrb[12].mxu1 %vm368_vm2, %v718_v22 }
 0x211   : > { %1150 = vmatprep.mubr.msk.bf16.mxu1 %vm1505_vm0, %v1504_v0 }
 0x2cb   : > { %v409_v23 = vpop.f32.mrb[0].mxu1 }
 0x2cc   : > { %v1102_v24 = vpop.f32.mrb[1].mxu1  ;;  %v415_v25 = vsel %vm368_vm2, %v409_v23, -inf }
 0x2cd   : > { %416 = vmax.xlane.f32.xlu1 %v415_v25  ;;  %v412_v26 = vpop.f32.mrb[2].mxu1 }
 0x2ce   : > { %v1103_v27 = vpop.f32.mrb[3].mxu1 }
 0x2d3   : > { %v523_v28 = vpop.f32.mrb[4].mxu1 }
 0x2d4   : > { %v1114_v29 = vpop.f32.mrb[5].mxu1  ;;  %v529_v30 = vsel %vm368_vm2, %v523_v28, -inf }
 0x2d5   : > { %530 = vmax.xlane.f32.xlu0 %v529_v30  ;;  %v526_v31 = vpop.f32.mrb[6].mxu1 }
 0x2d6   : > { %v1115_v32 = vpop.f32.mrb[7].mxu1 }
 0x2d7   : > { %v1261_v32 = vld [vmem:[#allocation9] sm:$0xff]  }
 0x2d8   : > { %1147 = vmatpush3.bf16.msra.mxu1 %v1261_v32 }
 0x2d9   : > { %1148 = vmatprep.subr.bf16.mxu1 %v1504_v0 }
 0x2db   : > { %v642_v33 = vpop.f32.mrb[8].mxu1 }
 0x2dc   : > { %v1126_v34 = vpop.f32.mrb[9].mxu1  ;;  %v648_v35 = vsel %vm368_vm2, %v642_v33, -inf }
 0x2dd   : > { %649 = vmax.xlane.f32.xlu0 %v648_v35  ;;  %v645_v36 = vpop.f32.mrb[10].mxu1 }
 0x2de   : > { %540 = vrot.lane.b32.xlu1 %v1797_v10, %s1513_s14  ;;  %v1127_v37 = vpop.f32.mrb[11].mxu1  ;;  %v1262_v36 = vld [vmem:[#allocation9 + $0x8] sm:$0xff]   ;;  %s1425_s14 = sshll.u32 %s1520_s8, 4  ;;  %s1426_s14 = int_to_ptr.vmem [resolvable:$false] %s1425_s14 }
 0x2df   : > { %1149 = vmatpush3.bf16.msra.mxu1 %v1262_v36  ;;  %p1428_p12 = scmp.lt.s32.totalorder %s1866_s26, %s1426_s14 }
 0x2e3   : > { %v761_v38 = vpop.f32.mrb[12].mxu1 }
 0x2e4   : > { %v1138_v39 = vpop.f32.mrb[13].mxu1  ;;  %v767_v42 = vsel %vm368_vm2, %v761_v38, -inf }
 0x2e5   : > { %v764_v40 = vpop.f32.mrb[14].mxu1 }
 0x2e6   : > { %v1139_v41 = vpop.f32.mrb[15].mxu1 }
 0x2f3   : > { %426 = vrot.lane.b32.xlu0 %v1797_v10, %s1514_s10  ;;  %s1427_s10 = scalar_lea.vmem %s1426_s14, 256 }
 0x2f4   : > { %p1429_p3 = scmp.lt.s32.totalorder %s1427_s10, %s1421_s27 }
 0x2f6   : > { %p1430_p13 = por %p1429_p3, %p1428_p12 }
 0x2f7   : > { %778 = vrot.lane.b32.xlu0 %v1797_v10, %s1515_s17 }
 0x2f8   : > { %p1431_p0 = pnand %p1430_p13, %p1424_p9 }
 0x302   : > { %768 = vmax.xlane.f32.xlu1 %v767_v42 }
 0x313   : > { %659 = vrot.lane.b32.xlu1 %v1797_v10, %s1516_s22 }
 0x35a   : > { %v417_v43 = vpop.xlane.xlu1 %416 }
 0x35b   : > { %v418_v44 = vsub.f32 %v409_v23, %v417_v43 }
 0x35d   : > { %v419_v45 = vmul.f32 1.442695, %v418_v44 }
 0x35e   : > { %v541_v55 = vpop.permute.xlu1 %540 }
 0x35f   : > { %1263 = vpow2.f32 %v419_v45  ;;  %v546_v59 = vsel %vm431_vm3, %v541_v55, 0 }
 0x362   : > { %v531_v46 = vpop.xlane.xlu0 %530 }
 0x363   : > { %v532_v47 = vsub.f32 %v523_v28, %v531_v46 }
 0x365   : > { %v533_v48 = vmul.f32 1.442695, %v532_v47 }
 0x367   : > { %1265 = vpow2.f32 %v533_v48 }
 0x369   : > { %v1264_v52 = vpop.eup %1263 }
 0x36a   : > { %v650_v49 = vpop.xlane.xlu0 %649  ;;  %v425_v57 = vpack.c.bf16 %v1264_v52, %v1264_v52  ;;  %v421_v60 = vsel %vm368_vm2, %v1264_v52, 0.0 }
 0x36b   : > { %v651_v50 = vsub.f32 %v642_v33, %v650_v49  ;;  %v1057_v49 = vld [vmem:[#allocation11] ss:$0 sm:$0xff] }
 0x36d   : > { %v652_v51 = vmul.f32 1.442695, %v651_v50 }
 0x36e   : > { %v427_v53 = vpop.permute.xlu0 %426 }
 0x36f   : > { %1267 = vpow2.f32 %v652_v51  ;;  %v433_v54 = vsel %vm431_vm3, %v427_v53, 0 }
 0x370   : > { %1105 = vmatpush3.bf16.msra.mxu0 %v433_v54 }
 0x371   : > { %v1266_v56 = vpop.eup %1265  ;;  %1116 = vmatprep.subr.bf16.mxu0 %v1504_v0 }
 0x372   : > { %v535_v58 = vsel %vm368_vm2, %v1266_v56, 0.0  ;;  %v539_v62 = vpack.c.bf16 %v1266_v56, %v1266_v56  ;;  %v779_v6 = vpop.permute.xlu0 %778 }
 0x373   : > { %536 = vadd.xlane.f32.xlu1 %v535_v58  ;;  %1107 = vmatmul.mubr.msk.bf16.vlgmr.msra.gmra.mrb[4].mxu0 %vm368_vm2, %v425_v57  ;;  %v784_v8 = vsel %vm431_vm3, %v779_v6, 0 }
 0x374   : > { %1117 = vmatpush3.bf16.msra.mxu0 %v546_v59  ;;  %1118 = vmatprep.mubr.msk.bf16.mxu0 %vm1505_vm0, %v1504_v0 }
 0x375   : > { %1128 = vmatprep.subr.bf16.mxu0 %v1504_v0 }
 0x377   : > { %422 = vadd.xlane.f32.xlu1 %v421_v60 }
 0x379   : > { %v1268_v61 = vpop.eup %1267 }
 0x37a   : > { %v654_v63 = vsel %vm368_vm2, %v1268_v61, 0.0  ;;  %v658_v7 = vpack.c.bf16 %v1268_v61, %v1268_v61 }
 0x37b   : > { %655 = vadd.xlane.f32.xlu0 %v654_v63  ;;  %1119 = vmatmul.mubr.msk.bf16.vlgmr.msra.gmra.mrb[8].mxu0 %vm368_vm2, %v539_v62 }
 0x37c   : > { %1130 = vmatprep.mubr.msk.bf16.mxu0 %vm1505_vm0, %v1504_v0 }
 0x38f   : > { %v769_v1 = vpop.xlane.xlu1 %768 }
 0x390   : > { %v770_v2 = vsub.f32 %v761_v38, %v769_v1 }
 0x392   : > { %v771_v3 = vmul.f32 1.442695, %v770_v2 }
 0x393   : > { %v660_v4 = vpop.permute.xlu1 %659 }
 0x394   : > { %1269 = vpow2.f32 %v771_v3  ;;  %v665_v5 = vsel %vm431_vm3, %v660_v4, 0 }
 0x395   : > { %1129 = vmatpush3.bf16.msra.mxu0 %v665_v5 }
 0x396   : > { %1140 = vmatprep.subr.bf16.mxu0 %v1504_v0 }
 0x398   : > { %1131 = vmatmul.mubr.msk.bf16.vlgmr.msra.gmra.mrb[12].mxu0 %vm368_vm2, %v658_v7 }
 0x399   : > { %1141 = vmatpush3.bf16.msra.mxu0 %v784_v8  ;;  %1142 = vmatprep.mubr.msk.bf16.mxu0 %vm1505_vm0, %v1504_v0 }
 0x39e   : > { %v1270_v9 = vpop.eup %1269 }
 0x39f   : > { %v773_v10 = vsel %vm368_vm2, %v1270_v9, 0.0  ;;  %v777_v11 = vpack.c.bf16 %v1270_v9, %v1270_v9 }
 0x3a0   : > { %774 = vadd.xlane.f32.xlu0 %v773_v10 }
 0x3a1   : > { %1143 = vmatmul.mubr.msk.bf16.vlgmr.msra.gmra.mrb[16].mxu0 %vm368_vm2, %v777_v11 }
 0x400   : > { %v537_v12 = vpop.xlane.xlu1 %536 }
 0x404   : > { %v423_v13 = vpop.xlane.xlu1 %422 }
 0x405   : > { %1271 = vrcp.f32 %v423_v13 }
 0x406   : > { %1273 = vrcp.f32 %v537_v12 }
 0x408   : > { %v656_v28 = vpop.xlane.xlu0 %655 }
 0x409   : > { %1275 = vrcp.f32 %v656_v28 }
 0x40f   : > { %v1272_v14 = vpop.eup %1271 }
 0x410   : > { %v1274_v21 = vpop.eup %1273 }
 0x413   : > { %v1276_v30 = vpop.eup %1275 }
 0x42d   : > { %v775_v29 = vpop.xlane.xlu0 %774 }
 0x42e   : > { %1277 = vrcp.f32 %v775_v29 }
 0x438   : > { %v1278_v39 = vpop.eup %1277 }
 0x446   : > { %v469_v15 = vpop.f32.mrb[4].mxu0 }
 0x447   : > { %v475_v16 = vmul.f32 %v1272_v14, %v469_v15  ;;  %v1108_v17 = vpop.f32.mrb[5].mxu0 }
 0x448   : > { %v472_v18 = vpop.f32.mrb[6].mxu0 }
 0x449   : > { %v476_v19 = vpack.c.bf16 %v475_v16, %v475_v16  ;;  %v1109_v20 = vpop.f32.mrb[7].mxu0 }
 0x44b   : > { %478 = vst.msk [vmem:[#allocation2] sm:$0xf] %vm477_vm4, %v476_v19 }
 0x44e   : > { %v582_v22 = vpop.f32.mrb[8].mxu0 }
 0x44f   : > { %v588_v23 = vmul.f32 %v1274_v21, %v582_v22  ;;  %v1120_v24 = vpop.f32.mrb[9].mxu0 }
 0x450   : > { %v585_v25 = vpop.f32.mrb[10].mxu0 }
 0x451   : > { %v1065_v26 = vpack.c.bf16 %v588_v23, %v588_v23  ;;  %v1121_v27 = vpop.f32.mrb[11].mxu0 }
 0x453   : > { %593 = vrot.lane.b32.xlu0 %v1065_v26, %s1517_s30 }
 0x46b   : > { %v701_v31 = vpop.f32.mrb[12].mxu0 }
 0x46c   : > { %v707_v33 = vmul.f32 %v1276_v30, %v701_v31  ;;  %v1132_v34 = vpop.f32.mrb[13].mxu0 }
 0x46d   : > { %v704_v35 = vpop.f32.mrb[14].mxu0 }
 0x46e   : > { %v1066_v37 = vpack.c.bf16 %v707_v33, %v707_v33  ;;  %v1133_v38 = vpop.f32.mrb[15].mxu0 }
 0x470   : > { %712 = vrot.lane.b32.xlu1 %v1066_v37, %s1518_s15 }
 0x474   : > { %v820_v40 = vpop.f32.mrb[16].mxu0 }
 0x475   : > { %v826_v41 = vmul.f32 %v1278_v39, %v820_v40  ;;  %v1144_v42 = vpop.f32.mrb[17].mxu0 }
 0x476   : > { %v823_v43 = vpop.f32.mrb[18].mxu0 }
 0x477   : > { %v1067_v44 = vpack.c.bf16 %v826_v41, %v826_v41  ;;  %v1145_v45 = vpop.f32.mrb[19].mxu0 }
 0x479   : > { %831 = vrot.lane.b32.xlu1 %v1067_v44, %s1519_s13 }
 0x4c5   : > { %v594_v46 = vpop.permute.xlu0 %593 }
 0x4c6   : > { %597 = vst.msk [vmem:[#allocation2] sm:$0xf] %vm596_vm5, %v594_v46 }
 0x4e2   : > { %v713_v47 = vpop.permute.xlu1 %712 }
 0x4e3   : > { %716 = vst.msk [vmem:[#allocation2] sm:$0xf] %vm715_vm6, %v713_v47 }
 0x4eb   : > { %v832_v0 = vpop.permute.xlu1 %831 }
 0x4ec   : > { %835 = vst.msk [vmem:[#allocation2] sm:$0xf] %vm834_vm7, %v832_v0 }
 0x4f3   : > { %v836_v48 = vld [vmem:[#allocation2] sm:$0xf] }
 0x4f4   : > { %1151 = vmatmul.mubr.msk.bf16.vlgmr.msra.gmra.mrb[16].mxu1 %vm320_vm1, %v836_v48 }
 0x5c7   : > { %v897_v50 = vpop.f32.mrb[16].mxu1 }
 0x5c8   : > { %v898_v51 = vadd.f32 %v1057_v49, %v897_v50  ;;  %v1152_v52 = vpop.f32.mrb[17].mxu1 }
 0x5c9   : > { %v900_v53 = vpop.f32.mrb[18].mxu1 }
 0x5ca   : > { %v1153_v54 = vpop.f32.mrb[19].mxu1  ;;  %903 = vst.msk [vmem:[%s293_s9] sm:$0xff] %vm320_vm1, %v898_v51 }
 0x5cb   : > { %1434 = shalt.err (!%p1431_p0)
}
 0x5cc   : > { %s1435_s11 = scalar_lea.hbm %s1864_s7, 128  ;;  %s1439_s30 = scalar_lea.hbm %s1914_s5, 256 }
 0x5cd   : > { %p1436_p2 = scmp.ne.s32.totalorder %s1864_s7, %s1435_s11  ;;  %p1440_p10 = scmp.lt.u32.totalorder %s1864_s7, %s1914_s5 }
 0x5ce   : > { %p1441_p11 = scmp.lt.u32.totalorder %s1439_s30, %s1435_s11  ;;  %p1443_p6 = scmp.lt.u32.totalorder %s1435_s11, %s1864_s7 }
 0x5cf   : > { %p1437_p8 = pnand %p1436_p2, %p1932_p5 }
 0x5d0   : > { %p1442_p1 = por %p1441_p11, %p1440_p10 }
 0x5d1   : > { %p1438_p4 = pneg %p1437_p8 }
 0x5d2   : > { %p1444_p7 = por %p1443_p6, %p1442_p1 }
 0x5d4   : > { %p1445_p9 = pnand %p1444_p7, %p1438_p4 }
 0x5d6   : > { %1448 = shalt.err (!%p1445_p9)
}
 0x5d7   : > { %1172 = dma.vmem_to_hbm [thread:$0]  (%p1932_p5), %s1866_s26, 128, %s1864_s7, %s905_s24  }
 0x5d8 PF: > { %s930_s25 = sand.u32 1, %s1483_s18   ;;  %p1933_p12 = scmp.ne.s32.totalorder %s1925_s12, 0 }
 0x5d9   : > { %p1934_p3 = scmp.ge.s32.totalorder %s1495_s21, 2  ;;  %s931_s9 = scalar_lea.sflag [#allocation5], %s930_s25 }
 0x5db   : > { %p1192_p13 = pnand %p1934_p3, %p1933_p12 }
 0x5dd   : > { %1478 = dma.done.wait (!%p1192_p13), %s931_s9, 128  }
 0x5de   : > { %1480 = vsyncadd (!%p1192_p13), %s931_s9, 4294967168  ;;  %p20_p0 = scmp.ge.s32.totalorder %s1692_s28, 4   ;;  %s1935_s18 = smov %s1487_s19 }
 0x5df   : > { %s1936_s19 = smov %s1491_s20  ;;  %s1937_s20 = smov %s1703_s16 }
 0x5e0   : > { %s1938_s21 = smov %s1692_s28  ;;  %22 = sbr.rel (!%p20_p0) target bundleno = 7 (0x7), region = 101 }
 0x5e7   :  { %936 = vsyncpa [#allocation4], 1 }
 0x5e8   :  { %938 = vsyncpa [#allocation4 + $0x1], 1 }
 0x5e9   :  { %939 = vsyncpa [#allocation7], 1 }
 0x5ea   :  { %940 = vsyncpa [#allocation10], 1 }
 0x5eb   :  { %941 = vsyncpa [#allocation5], 1 }
 0x5ec   :  { %943 = vsyncpa [#allocation5 + $0x1], 1 }

// kernel: tpu_custom_call.1
= control target key start
LH: loop header
LB: loop body
LE: loop exit
PB: predicated region body
PF: predicated region fallthrough
CT: control target
= control target key end

     0   :  { %10 = vsyncpa [#allocation4], 0  ;;  %s1909_s0 = inlined_call_operand.hbm [shape: f32[2,8,32], index: 0, kind: input, shape index: {}]   ;;  %s1910_s1 = inlined_call_operand.hbm [shape: bf16[32,96], index: 1, kind: input, shape index: {}]   ;;  %s1911_s2 = inlined_call_operand.hbm [shape: f32[1,96], index: 2, kind: input, shape index: {}]   ;;  %s1912_s3 = inlined_call_operand.hbm [shape: bf16[32,32], index: 3, kind: input, shape index: {}]   ;;  %s1913_s4 = inlined_call_operand.hbm [shape: f32[1,32], index: 4, kind: input, shape index: {}]   ;;  %s1914_s5 = inlined_call_operand.hbm [shape: f32[2,8,32], index: 5, kind: output, shape index: {}]  }
   0x1   :  { %12 = vsyncpa [#allocation4 + $0x1], 0 }
   0x2   :  { %13 = vsyncpa [#allocation7], 0 }
   0x3   :  { %14 = vsyncpa [#allocation10], 0 }
   0x4   :  { %15 = vsyncpa [#allocation5], 0 }
   0x5   :  { %17 = vsyncpa [#allocation5 + $0x1], 0  ;;  %s1551_s18 = smov 0   ;;  %s1553_s19 = smov 0  }
   0x6   :  { %s1555_s20 = smov 0   ;;  %s1557_s21 = smov 0  }
   0x7 LB: > { %s1497_s22 = smov [#allocation6]   ;;  %s1572_s24 = sadd.s32 4294967295, %s1495_s21   ;;  %s1495_s21 = sphi %s1557_s21, %s1938_s21   ;;  %s1491_s20 = sphi %s1555_s20, %s1937_s20   ;;  %s1487_s19 = sphi %s1553_s19, %s1936_s19   ;;  %s1483_s18 = sphi %s1551_s18, %s1935_s18  }
   0x8   : > { %s176_s23 = sshll.u32 %s1497_s22, 4  ;;  %p1027_p0 = scmp.ge.s32.totalorder %s1495_s21, 1  ;;  %s1577_s23 = int_to_ptr.vmem [resolvable:$true] %s176_s23 }
   0x9   : > { %p1915_p1 = scmp.eq.s32.totalorder %s1572_s24, 0  ;;  %p164_p2 = scmp.lt.s32.totalorder %s1495_s21, 3 }
   0xa   : > { %s1498_s26 = smov [#allocation9]   ;;  %s1499_s29 = smov [#allocation8]  }
   0xb   : > { %p1579_p3 = pnand %p1027_p0, %p164_p2  ;;  %s200_s27 = sshll.u32 %s1498_s26, 4  ;;  %s1592_s27 = int_to_ptr.vmem [resolvable:$true] %s200_s27 }
   0xc   : > { %s190_s30 = sshll.u32 %s1499_s29, 4  ;;  %s1279_s8 = scalar_lea.hbm %s1910_s1, 256  ;;  %s1594_s30 = int_to_ptr.vmem [resolvable:$true] %s190_s30 }
   0xd   : > { %s1918_s25 = scalar_select %p1579_p3, 1, 0 }
   0xe   : > { %p1174_p5 = pneg %p1579_p3  ;;  %p1280_p7 = scmp.ne.s32.totalorder %s1910_s1, %s1279_s8 }
   0xf   : > { %p1286_p11 = scmp.lt.u32.totalorder %s1279_s8, %s1910_s1 }
  0x10   : > { %p1588_p6 = pnand %p1174_p5, %p1915_p1 }
  0x12   : > { %p1604_p8 = pneg %p1588_p6 }
  0x14   : > { %p1282_p9 = pnand %p1604_p8, %p1280_p7 }
  0x16   : > { %p1283_p10 = pneg %p1282_p9 }
  0x18   : > { %p1288_p12 = pnand %p1286_p11, %p1283_p10 }
  0x1a   : > { %1291 = shalt.err (!%p1288_p12)
}
  0x1b   : > { %s1292_s14 = scalar_lea.vmem %s1577_s23, 256  ;;  %p1300_p5 = scmp.lt.s32.totalorder %s1577_s23, %s1577_s23 }
  0x1c   : > { %p1293_p13 = scmp.ne.s32.totalorder %s1577_s23, %s1292_s14  ;;  %p1301_p4 = scmp.lt.s32.totalorder %s1292_s14, %s1292_s14 }
  0x1e   : > { %p1295_p0 = pnand %p1293_p13, %p1604_p8  ;;  %p1302_p7 = por %p1301_p4, %p1300_p5 }
  0x20   : > { %p1296_p2 = pneg %p1295_p0 }
  0x22   : > { %p1303_p9 = pnand %p1302_p7, %p1296_p2 }
  0x24   : > { %1306 = shalt.err (!%p1303_p9)
}
  0x25   : > { %s1500_s15 = smov 64   ;;  %s1501_s16 = smov 4  }
  0x26   : > { %1177 = dma.hbm_to_vmem [thread:$0]  (!%p1588_p6), %s1910_s1, 256, %s1577_s23, [#allocation7], %s1500_s15, %s1500_s15, %s1501_s16  }
  0x27   : > { %s1307_s6 = scalar_lea.hbm %s1912_s3, 256 }
  0x28   : > { %p1308_p4 = scmp.ne.s32.totalorder %s1912_s3, %s1307_s6  ;;  %p1314_p12 = scmp.lt.u32.totalorder %s1307_s6, %s1912_s3 }
  0x2a   : > { %p1310_p10 = pnand %p1308_p4, %p1604_p8 }
  0x2c   : > { %p1311_p11 = pneg %p1310_p10 }
  0x2e   : > { %p1316_p13 = pnand %p1314_p12, %p1311_p11 }
  0x30   : > { %1319 = shalt.err (!%p1316_p13)
}
  0x31   : > { %s1320_s23 = scalar_lea.vmem %s1592_s27, 256  ;;  %p1328_p7 = scmp.lt.s32.totalorder %s1592_s27, %s1592_s27 }
  0x32   : > { %p1321_p0 = scmp.ne.s32.totalorder %s1592_s27, %s1320_s23  ;;  %p1329_p9 = scmp.lt.s32.totalorder %s1320_s23, %s1320_s23 }
  0x34   : > { %p1323_p2 = pnand %p1321_p0, %p1604_p8  ;;  %p1330_p4 = por %p1329_p9, %p1328_p7 }
  0x36   : > { %p1324_p5 = pneg %p1323_p2 }
  0x38   : > { %p1331_p10 = pnand %p1330_p4, %p1324_p5 }
  0x3a   : > { %1334 = shalt.err (!%p1331_p10)
}
  0x3b   : > { %1183 = dma.hbm_to_vmem [thread:$0]  (!%p1588_p6), %s1912_s3, 256, %s1592_s27, [#allocation10], %s1500_s15, %s1500_s15, %s1501_s16  }
  0x3c   : > { %s1335_s22 = scalar_lea.hbm %s1911_s2, 16 }
  0x3d   : > { %p1336_p11 = scmp.ne.s32.totalorder %s1911_s2, %s1335_s22  ;;  %p1342_p0 = scmp.lt.u32.totalorder %s1335_s22, %s1911_s2 }
  0x3f   : > { %p1338_p12 = pnand %p1336_p11, %p1604_p8 }
  0x41   : > { %p1339_p13 = pneg %p1338_p12 }
  0x43   : > { %p1344_p2 = pnand %p1342_p0, %p1339_p13 }
  0x45   : > { %1347 = shalt.err (!%p1344_p2)
}
  0x46   : > { %s1348_s27 = scalar_lea.vmem %s1594_s30, 16  ;;  %s1355_s15 = scalar_lea.vmem %s1594_s30, 32 }
  0x47   : > { %p1349_p5 = scmp.ne.s32.totalorder %s1594_s30, %s1348_s27  ;;  %p1356_p4 = scmp.lt.s32.totalorder %s1594_s30, %s1594_s30 }
  0x48   : > { %p1357_p10 = scmp.lt.s32.totalorder %s1355_s15, %s1348_s27 }
  0x49   : > { %p1351_p7 = pnand %p1349_p5, %p1604_p8 }
  0x4a   : > { %p1358_p11 = por %p1357_p10, %p1356_p4 }
  0x4b   : > { %p1352_p9 = pneg %p1351_p7 }
  0x4d   : > { %p1359_p12 = pnand %p1358_p11, %p1352_p9 }
  0x4f   : > { %1362 = shalt.err (!%p1359_p12)
}
  0x50   : > { %1180 = dma.hbm_to_vmem [thread:$0]  (!%p1588_p6), %s1911_s2, 16, %s1594_s30, [#allocation7]  }
  0x51   : > { %s1502_s9 = smov [#allocation11]   ;;  %s1363_s13 = scalar_lea.hbm %s1913_s4, 16 }
  0x52   : > { %s214_s10 = sshll.u32 %s1502_s9, 4  ;;  %p1364_p13 = scmp.ne.s32.totalorder %s1913_s4, %s1363_s13  ;;  %s215_s10 = int_to_ptr.vmem [resolvable:$true] %s214_s10 }
  0x53   : > { %p1370_p5 = scmp.lt.u32.totalorder %s1363_s13, %s1913_s4 }
  0x54   : > { %p1366_p0 = pnand %p1364_p13, %p1604_p8 }
  0x56   : > { %p1367_p2 = pneg %p1366_p0 }
  0x58   : > { %p1372_p7 = pnand %p1370_p5, %p1367_p2 }
  0x5a   : > { %1375 = shalt.err (!%p1372_p7)
}
  0x5b   : > { %s1376_s30 = scalar_lea.vmem %s215_s10, 16  ;;  %s1383_s29 = scalar_lea.vmem %s215_s10, 32 }
  0x5c   : > { %p1377_p9 = scmp.ne.s32.totalorder %s215_s10, %s1376_s30  ;;  %p1384_p11 = scmp.lt.s32.totalorder %s215_s10, %s215_s10 }
  0x5d   : > { %p1385_p12 = scmp.lt.s32.totalorder %s1383_s29, %s1376_s30 }
  0x5e   : > { %p1379_p4 = pnand %p1377_p9, %p1604_p8 }
  0x5f   : > { %p1386_p1 = por %p1385_p12, %p1384_p11 }
  0x60   : > { %p1380_p10 = pneg %p1379_p4 }
  0x62   : > { %p1387_p3 = pnand %p1386_p1, %p1380_p10 }
  0x64   : > { %1390 = shalt.err (!%p1387_p3)
}
  0x65   : > { %1186 = dma.hbm_to_vmem [thread:$0]  (!%p1588_p6), %s1913_s4, 16, %s215_s10, [#allocation10]  }
  0x66   : > { %s1026_s11 = sadd.s32 4294967294, %s1495_s21   ;;  %s1692_s28 = sadd.s32 1, %s1495_s21  }
  0x67   : > { %s27_s27 = ssub.s32 %s1495_s21, %s1692_s28  ;;  %s30_s15 = sadd.s32 1, %s1491_s20 }
  0x68   : > { %p28_p1 = scmp.eq.s32.totalorder %s27_s27, 0  ;;  %p37_p3 = scmp.ne.s32.totalorder %s1491_s20, %s1487_s19 }
  0x69   : > { %p38_p8 = scmp.eq.s32.totalorder %s1495_s21, 0  ;;  %p43_p13 = scmp.ne.s32.totalorder %s1487_s19, %s1483_s18 }
  0x6a   : > { %s1703_s16 = scalar_select %p28_p1, %s1491_s20, %s30_s15  }
  0x6b   : > { %p1705_p0 = por %p38_p8, %p37_p3  ;;  %p1922_p2 = scmp.eq.s32.totalorder %s1572_s24, 0 }
  0x6c   : > { %p151_p5 = scmp.eq.s32.totalorder %s1572_s24, 1  ;;  %p157_p7 = scmp.eq.s32.totalorder %s1026_s11, 1 }
  0x6d   : > { %p1711_p6 = por %p1922_p2, %p43_p13  ;;  %p1199_p9 = scmp.lt.s32.totalorder %s1495_s21, 2 }
  0x6e   : > { %s225_s10 = sand.u32 1, %s1491_s20   ;;  %p1718_p4 = por %p151_p5, %p37_p3 }
  0x6f   : > { %p1722_p10 = por %p157_p7, %p43_p13  ;;  %s1033_s13 = sshll.u32 %s225_s10, 3 }
  0x70   : > { %s1924_s23 = scalar_select %p1718_p4, 1, 0 }
  0x71   : > { %s1925_s12 = scalar_select %p1722_p10, 1, 0 }
  0x72   : > { %s1034_s14 = sshll.u32 %s1495_s21, 7  ;;  %s229_s30 = scalar_lea.vmem [#allocation3], %s1033_s13 }
  0x73   : > { %s1730_s26 = scalar_lea.hbm %s1909_s0, %s1034_s14  ;;  %s236_s29 = sshll.u32 %s229_s30, 4  ;;  %s1732_s29 = int_to_ptr.vmem [resolvable:$true] %s236_s29 }
  0x74   : > { %p1736_p11 = pnand %p1199_p9, %p1705_p0  ;;  %s226_s7 = scalar_lea.sflag [#allocation4], %s225_s10 }
  0x75   : > { %s1391_s11 = scalar_lea.hbm %s1730_s26, 128  ;;  %s1396_s13 = scalar_lea.hbm %s1909_s0, 256 }
  0x76   : > { %p1392_p12 = scmp.ne.s32.totalorder %s1730_s26, %s1391_s11  ;;  %p1393_p1 = pneg %p1736_p11 }
  0x77   : > { %p1397_p13 = scmp.lt.u32.totalorder %s1730_s26, %s1909_s0  ;;  %p1398_p0 = scmp.lt.u32.totalorder %s1396_s13, %s1391_s11 }
  0x78   : > { %p1394_p3 = pnand %p1393_p1, %p1392_p12  ;;  %p1400_p5 = scmp.lt.u32.totalorder %s1391_s11, %s1730_s26 }
  0x79   : > { %p1399_p2 = por %p1398_p0, %p1397_p13 }
  0x7a   : > { %p1395_p8 = pneg %p1394_p3 }
  0x7b   : > { %p1401_p7 = por %p1400_p5, %p1399_p2 }
  0x7d   : > { %p1402_p9 = pnand %p1401_p7, %p1395_p8 }
  0x7f   : > { %1405 = shalt.err (!%p1402_p9)
}
  0x80   : > { %s1406_s10 = scalar_lea.vmem %s1732_s29, 128  ;;  %s1503_s17 = smov [#allocation3]  }
  0x81   : > { %p1407_p12 = scmp.ne.s32.totalorder %s1732_s29, %s1406_s10  ;;  %s1411_s22 = sshll.u32 %s1503_s17, 4  ;;  %s1412_s22 = int_to_ptr.vmem [resolvable:$false] %s1411_s22 }
  0x82   : > { %s1413_s30 = scalar_lea.vmem %s1412_s22, 256  ;;  %p1414_p4 = scmp.lt.s32.totalorder %s1732_s29, %s1412_s22 }
  0x83   : > { %p1409_p3 = pnand %p1407_p12, %p1393_p1  ;;  %p1415_p13 = scmp.lt.s32.totalorder %s1413_s30, %s1406_s10 }
  0x85   : > { %p1410_p10 = pneg %p1409_p3  ;;  %p1416_p0 = por %p1415_p13, %p1414_p4 }
  0x87   : > { %p1417_p2 = pnand %p1416_p0, %p1410_p10 }
  0x89   : > { %1420 = shalt.err (!%p1417_p2)
}
  0x8a   : > { %1190 = dma.hbm_to_vmem [thread:$0]  (!%p1736_p11), %s1730_s26, 128, %s1732_s29, %s226_s7  }
  0x8b   : > { %p1927_p8 = scmp.ne.s32.totalorder %s1918_s25, 0 }
  0x8c   : > { %s1768_s11 = sand.u32 (!%p1927_p8), 1, %s1487_s19  }
  0x8d   : > { %245 = sbr.rel (%p1927_p8) target bundleno = 1496 (0x5d8), region = 40  ;;  %s1036_s27 = sshll.u32 (!%p1927_p8), %s1768_s11, 3 }
  0x8e   : > { %s248_s15 = scalar_lea.sflag (!%p1927_p8), [#allocation4], %s1768_s11  ;;  %s251_s13 = scalar_lea.vmem (!%p1927_p8), [#allocation3], %s1036_s27 }
  0x94   : > { %1466 = dma.done.wait (%p1711_p6), %s248_s15, 128  }
  0x95   : > { %1468 = vsyncadd (%p1711_p6), %s248_s15, 4294967168  ;;  %p1928_p4 = scmp.eq.s32.totalorder %s1572_s24, 0 }
  0x97   : > { %1470 = dma.done.wait (%p1928_p4), [#allocation7], 272   ;;  %p1929_p10 = pmov %p1928_p4 }
  0x98   : > { %p1930_p11 = pmov %p1928_p4 }
  0x99   : > { %1472 = vsyncadd (%p1929_p10), [#allocation7], 4294967024 }
  0x9a   : > { %1474 = dma.done.wait (%p1930_p11), [#allocation10], 272   ;;  %p1931_p1 = pmov %p1928_p4 }
  0x9b   : > { %v1504_v0 = vmov 0.0   ;;  %vm1505_vm0 = vmmov 0   ;;  %v1259_v1 = vld [vmem:[#allocation6] sm:$0xff]   ;;  %v1260_v2 = vld [vmem:[#allocation6 + $0x8] sm:$0xff]   ;;  %v295_v3 = vld [vmem:[%s251_s13] sm:$0xff]  ;;  %vm320_vm1 = vcmask 261120  }
  0x9c   : > { %1476 = vsyncadd (%p1931_p1), [#allocation10], 4294967024  ;;  %1090 = vmatprep.subr.bf16.mxu0 %v1504_v0  ;;  %1094 = vmatprep.mubr.msk.bf16.mxu0 %vm1505_vm0, %v1504_v0  ;;  %v296_v4 = vpack.c.bf16 %v295_v3, %v295_v3  ;;  %v1042_v5 = vld [vmem:[#allocation8] ss:$0 sm:$0xff]  ;;  %s1506_s25 = smov 120   ;;  %s1507_s9 = smov 96  }
  0x9d   : > { %1098 = vmatprep.subr.bf16.mxu1 %v1504_v0  ;;  %1100 = vmatprep.mubr.msk.bf16.mxu1 %vm1505_vm0, %v1504_v0  ;;  %s1508_s26 = smov 80   ;;  %s1509_s29 = smov 88   ;;  %vm368_vm2 = vcmask 64512   ;;  %vm431_vm3 = vcmask 1043456   ;;  %vm477_vm4 = vcmask 60416   ;;  %vm596_vm5 = vcmask 126016  }
  0x9e   : > { %1091 = vmatpush3.bf16.msra.mxu0 %v1259_v1  ;;  %s1510_s6 = smov 72   ;;  %s1511_s7 = smov 112   ;;  %vm715_vm6 = vcmask 191616   ;;  %vm834_vm7 = vcmask 257216  }
  0x9f   : > { %1092 = vmatprep.subr.bf16.mxu0 %v1504_v0  ;;  %s1512_s8 = smov 104   ;;  %s1513_s14 = smov 56  }
  0xa0   : > { %s1514_s10 = smov 64   ;;  %s1515_s17 = smov 40  }
  0xa1   : > { %s1516_s22 = smov 48   ;;  %s1517_s30 = smov 8  }
  0xa2   : > { %1093 = vmatpush3.bf16.msra.mxu0 %v1260_v2  ;;  %s1518_s15 = smov 16   ;;  %s1519_s13 = smov 24  }
  0xa3   : > { %1104 = vmatprep.subr.bf16.mxu0 %v1504_v0  ;;  %p1932_p5 = scmp.ne.s32.totalorder %s1924_s23, 0 }
  0xa5   : > { %1095 = vmatmul.mubr.msk.bf16.vlgmr.msra.gmra.mrb[0].mxu0 %vm320_vm1, %v296_v4 }
  0xa6   : > { %1106 = vmatprep.mubr.msk.bf16.mxu0 %vm1505_vm0, %v1504_v0 }
 0x178   : > { %v358_v6 = vpop.f32.mrb[0].mxu0 }
 0x179   : > { %v359_v7 = vadd.f32 %v1042_v5, %v358_v6  ;;  %v1096_v8 = vpop.f32.mrb[1].mxu0 }
 0x17a   : > { %v361_v9 = vpop.f32.mrb[2].mxu0 }
 0x17b   : > { %v1797_v10 = vpack.c.bf16 %v359_v7, %v359_v7  ;;  %v1097_v11 = vpop.f32.mrb[3].mxu0 }
 0x17d   : > { %479 = vrot.lane.b32.xlu1 %v1797_v10, %s1506_s25  ;;  %366 = vrot.lane.b32.xlu0 %v1797_v10, %s1507_s9  ;;  %s1062_s25 = sshll.u32 %s1572_s24, 7  ;;  %s293_s9 = scalar_lea.vmem [#allocation12], %s1036_s27 }
 0x17e   : > { %s905_s24 = scalar_lea.sflag [#allocation5], %s1768_s11 }
 0x181   : > { %600 = vrot.lane.b32.xlu1 %v1797_v10, %s1508_s26  ;;  %481 = vrot.lane.b32.xlu0 %v1797_v10, %s1509_s29  ;;  %s918_s26 = sshll.u32 %s293_s9, 4  ;;  %s1866_s26 = int_to_ptr.vmem [resolvable:$true] %s918_s26 }
 0x182   : > { %s1421_s27 = scalar_lea.vmem %s1866_s26, 128 }
 0x183   : > { %p1422_p6 = scmp.ne.s32.totalorder %s1866_s26, %s1421_s27 }
 0x185   : > { %719 = vrot.lane.b32.xlu1 %v1797_v10, %s1510_s6  ;;  %598 = vrot.lane.b32.xlu0 %v1797_v10, %s1511_s7  ;;  %s1864_s7 = scalar_lea.hbm %s1914_s5, %s1062_s25  ;;  %p1423_p7 = pnand %p1422_p6, %p1932_p5 }
 0x187   : > { %p1424_p9 = pneg %p1423_p7 }
 0x189   : > { %717 = vrot.lane.b32.xlu0 %v1797_v10, %s1512_s8  ;;  %s1520_s8 = smov [#allocation12]  }
 0x1ef   : > { %v367_v12 = vpop.permute.xlu0 %366  ;;  %v480_v15 = vpop.permute.xlu1 %479 }
 0x1f0   : > { %v373_v13 = vsel %vm368_vm2, %v367_v12, 0 }
 0x1f1   : > { %1099 = vmatpush3.bf16.xpose.msra.mxu1 %v373_v13 }
 0x1f2   : > { %1110 = vmatprep.subr.bf16.mxu1 %v1504_v0 }
 0x1f3   : > { %v482_v14 = vpop.permute.xlu0 %481  ;;  %v601_v17 = vpop.permute.xlu1 %600 }
 0x1f4   : > { %v487_v16 = vsel %vm368_vm2, %v482_v14, 0  ;;  %v606_v18 = vsel %vm368_vm2, %v601_v17, 0 }
 0x1f7   : > { %v720_v19 = vpop.permute.xlu1 %719  ;;  %v599_v20 = vpop.permute.xlu0 %598 }
 0x1f8   : > { %1101 = vmatmul.mubr.msk.bf16.vlgmr.msra.gmra.mrb[0].mxu1 %vm368_vm2, %v1797_v10  ;;  %v725_v21 = vsel %vm368_vm2, %v720_v19, 0 }
 0x1f9   : > { %1111 = vmatpush3.bf16.xpose.msra.mxu1 %v487_v16  ;;  %1112 = vmatprep.mubr.msk.bf16.mxu1 %vm1505_vm0, %v1504_v0 }
 0x1fa   : > { %1122 = vmatprep.subr.bf16.mxu1 %v1504_v0 }
 0x1fb   : > { %v718_v22 = vpop.permute.xlu0 %717 }
 0x200   : > { %1113 = vmatmul.mubr.msk.bf16.vlgmr.msra.gmra.mrb[4].mxu1 %vm368_vm2, %v480_v15 }
 0x201   : > { %1123 = vmatpush3.bf16.xpose.msra.mxu1 %v606_v18  ;;  %1124 = vmatprep.mubr.msk.bf16.mxu1 %vm1505_vm0, %v1504_v0 }
 0x202   : > { %1134 = vmatprep.subr.bf16.mxu1 %v1504_v0 }
 0x208   : > { %1125 = vmatmul.mubr.msk.bf16.vlgmr.msra.gmra.mrb[8].mxu1 %vm368_vm2, %v599_v20 }
 0x209   : > { %1135 = vmatpush3.bf16.xpose.msra.mxu1 %v725_v21  ;;  %1136 = vmatprep.mubr.msk.bf16.mxu1 %vm1505_vm0, %v1504_v0 }
 0x20a   : > { %1146 = vmatprep.subr.bf16.mxu1 %v1504_v0 }
 0x210   : > { %1137 = vmatmul.mubr.msk.bf16.vlgmr.msra.gmra.mrb[12].mxu1 %vm368_vm2, %v718_v22 }
 0x211   : > { %1150 = vmatprep.mubr.msk.bf16.mxu1 %vm1505_vm0, %v1504_v0 }
 0x2cb   : > { %v409_v23 = vpop.f32.mrb[0].mxu1 }
 0x2cc   : > { %v1102_v24 = vpop.f32.mrb[1].mxu1  ;;  %v415_v25 = vsel %vm368_vm2, %v409_v23, -inf }
 0x2cd   : > { %416 = vmax.xlane.f32.xlu1 %v415_v25  ;;  %v412_v26 = vpop.f32.mrb[2].mxu1 }
 0x2ce   : > { %v1103_v27 = vpop.f32.mrb[3].mxu1 }
 0x2d3   : > { %v523_v28 = vpop.f32.mrb[4].mxu1 }
 0x2d4   : > { %v1114_v29 = vpop.f32.mrb[5].mxu1  ;;  %v529_v30 = vsel %vm368_vm2, %v523_v28, -inf }
 0x2d5   : > { %530 = vmax.xlane.f32.xlu0 %v529_v30  ;;  %v526_v31 = vpop.f32.mrb[6].mxu1 }
 0x2d6   : > { %v1115_v32 = vpop.f32.mrb[7].mxu1 }
 0x2d7   : > { %v1261_v32 = vld [vmem:[#allocation9] sm:$0xff]  }
 0x2d8   : > { %1147 = vmatpush3.bf16.msra.mxu1 %v1261_v32 }
 0x2d9   : > { %1148 = vmatprep.subr.bf16.mxu1 %v1504_v0 }
 0x2db   : > { %v642_v33 = vpop.f32.mrb[8].mxu1 }
 0x2dc   : > { %v1126_v34 = vpop.f32.mrb[9].mxu1  ;;  %v648_v35 = vsel %vm368_vm2, %v642_v33, -inf }
 0x2dd   : > { %649 = vmax.xlane.f32.xlu0 %v648_v35  ;;  %v645_v36 = vpop.f32.mrb[10].mxu1 }
 0x2de   : > { %540 = vrot.lane.b32.xlu1 %v1797_v10, %s1513_s14  ;;  %v1127_v37 = vpop.f32.mrb[11].mxu1  ;;  %v1262_v36 = vld [vmem:[#allocation9 + $0x8] sm:$0xff]   ;;  %s1425_s14 = sshll.u32 %s1520_s8, 4  ;;  %s1426_s14 = int_to_ptr.vmem [resolvable:$false] %s1425_s14 }
 0x2df   : > { %1149 = vmatpush3.bf16.msra.mxu1 %v1262_v36  ;;  %p1428_p12 = scmp.lt.s32.totalorder %s1866_s26, %s1426_s14 }
 0x2e3   : > { %v761_v38 = vpop.f32.mrb[12].mxu1 }
 0x2e4   : > { %v1138_v39 = vpop.f32.mrb[13].mxu1  ;;  %v767_v42 = vsel %vm368_vm2, %v761_v38, -inf }
 0x2e5   : > { %v764_v40 = vpop.f32.mrb[14].mxu1 }
 0x2e6   : > { %v1139_v41 = vpop.f32.mrb[15].mxu1 }
 0x2f3   : > { %426 = vrot.lane.b32.xlu0 %v1797_v10, %s1514_s10  ;;  %s1427_s10 = scalar_lea.vmem %s1426_s14, 256 }
 0x2f4   : > { %p1429_p3 = scmp.lt.s32.totalorder %s1427_s10, %s1421_s27 }
 0x2f6   : > { %p1430_p13 = por %p1429_p3, %p1428_p12 }
 0x2f7   : > { %778 = vrot.lane.b32.xlu0 %v1797_v10, %s1515_s17 }
 0x2f8   : > { %p1431_p0 = pnand %p1430_p13, %p1424_p9 }
 0x302   : > { %768 = vmax.xlane.f32.xlu1 %v767_v42 }
 0x313   : > { %659 = vrot.lane.b32.xlu1 %v1797_v10, %s1516_s22 }
 0x35a   : > { %v417_v43 = vpop.xlane.xlu1 %416 }
 0x35b   : > { %v418_v44 = vsub.f32 %v409_v23, %v417_v43 }
 0x35d   : > { %v419_v45 = vmul.f32 1.442695, %v418_v44 }
 0x35e   : > { %v541_v55 = vpop.permute.xlu1 %540 }
 0x35f   : > { %1263 = vpow2.f32 %v419_v45  ;;  %v546_v59 = vsel %vm431_vm3, %v541_v55, 0 }
 0x362   : > { %v531_v46 = vpop.xlane.xlu0 %530 }
 0x363   : > { %v532_v47 = vsub.f32 %v523_v28, %v531_v46 }
 0x365   : > { %v533_v48 = vmul.f32 1.442695, %v532_v47 }
 0x367   : > { %1265 = vpow2.f32 %v533_v48 }
 0x369   : > { %v1264_v52 = vpop.eup %1263 }
 0x36a   : > { %v650_v49 = vpop.xlane.xlu0 %649  ;;  %v425_v57 = vpack.c.bf16 %v1264_v52, %v1264_v52  ;;  %v421_v60 = vsel %vm368_vm2, %v1264_v52, 0.0 }
 0x36b   : > { %v651_v50 = vsub.f32 %v642_v33, %v650_v49  ;;  %v1057_v49 = vld [vmem:[#allocation11] ss:$0 sm:$0xff] }
 0x36d   : > { %v652_v51 = vmul.f32 1.442695, %v651_v50 }
 0x36e   : > { %v427_v53 = vpop.permute.xlu0 %426 }
 0x36f   : > { %1267 = vpow2.f32 %v652_v51  ;;  %v433_v54 = vsel %vm431_vm3, %v427_v53, 0 }
 0x370   : > { %1105 = vmatpush3.bf16.msra.mxu0 %v433_v54 }
 0x371   : > { %v1266_v56 = vpop.eup %1265  ;;  %1116 = vmatprep.subr.bf16.mxu0 %v1504_v0 }
 0x372   : > { %v535_v58 = vsel %vm368_vm2, %v1266_v56, 0.0  ;;  %v539_v62 = vpack.c.bf16 %v1266_v56, %v1266_v56  ;;  %v779_v6 = vpop.permute.xlu0 %778 }
 0x373   : > { %536 = vadd.xlane.f32.xlu1 %v535_v58  ;;  %1107 = vmatmul.mubr.msk.bf16.vlgmr.msra.gmra.mrb[4].mxu0 %vm368_vm2, %v425_v57  ;;  %v784_v8 = vsel %vm431_vm3, %v779_v6, 0 }
 0x374   : > { %1117 = vmatpush3.bf16.msra.mxu0 %v546_v59  ;;  %1118 = vmatprep.mubr.msk.bf16.mxu0 %vm1505_vm0, %v1504_v0 }
 0x375   : > { %1128 = vmatprep.subr.bf16.mxu0 %v1504_v0 }
 0x377   : > { %422 = vadd.xlane.f32.xlu1 %v421_v60 }
 0x379   : > { %v1268_v61 = vpop.eup %1267 }
 0x37a   : > { %v654_v63 = vsel %vm368_vm2, %v1268_v61, 0.0  ;;  %v658_v7 = vpack.c.bf16 %v1268_v61, %v1268_v61 }
 0x37b   : > { %655 = vadd.xlane.f32.xlu0 %v654_v63  ;;  %1119 = vmatmul.mubr.msk.bf16.vlgmr.msra.gmra.mrb[8].mxu0 %vm368_vm2, %v539_v62 }
 0x37c   : > { %1130 = vmatprep.mubr.msk.bf16.mxu0 %vm1505_vm0, %v1504_v0 }
 0x38f   : > { %v769_v1 = vpop.xlane.xlu1 %768 }
 0x390   : > { %v770_v2 = vsub.f32 %v761_v38, %v769_v1 }
 0x392   : > { %v771_v3 = vmul.f32 1.442695, %v770_v2 }
 0x393   : > { %v660_v4 = vpop.permute.xlu1 %659 }
 0x394   : > { %1269 = vpow2.f32 %v771_v3  ;;  %v665_v5 = vsel %vm431_vm3, %v660_v4, 0 }
 0x395   : > { %1129 = vmatpush3.bf16.msra.mxu0 %v665_v5 }
 0x396   : > { %1140 = vmatprep.subr.bf16.mxu0 %v1504_v0 }
 0x398   : > { %1131 = vmatmul.mubr.msk.bf16.vlgmr.msra.gmra.mrb[12].mxu0 %vm368_vm2, %v658_v7 }
 0x399   : > { %1141 = vmatpush3.bf16.msra.mxu0 %v784_v8  ;;  %1142 = vmatprep.mubr.msk.bf16.mxu0 %vm1505_vm0, %v1504_v0 }
 0x39e   : > { %v1270_v9 = vpop.eup %1269 }
 0x39f   : > { %v773_v10 = vsel %vm368_vm2, %v1270_v9, 0.0  ;;  %v777_v11 = vpack.c.bf16 %v1270_v9, %v1270_v9 }
 0x3a0   : > { %774 = vadd.xlane.f32.xlu0 %v773_v10 }
 0x3a1   : > { %1143 = vmatmul.mubr.msk.bf16.vlgmr.msra.gmra.mrb[16].mxu0 %vm368_vm2, %v777_v11 }
 0x400   : > { %v537_v12 = vpop.xlane.xlu1 %536 }
 0x404   : > { %v423_v13 = vpop.xlane.xlu1 %422 }
 0x405   : > { %1271 = vrcp.f32 %v423_v13 }
 0x406   : > { %1273 = vrcp.f32 %v537_v12 }
 0x408   : > { %v656_v28 = vpop.xlane.xlu0 %655 }
 0x409   : > { %1275 = vrcp.f32 %v656_v28 }
 0x40f   : > { %v1272_v14 = vpop.eup %1271 }
 0x410   : > { %v1274_v21 = vpop.eup %1273 }
 0x413   : > { %v1276_v30 = vpop.eup %1275 }
 0x42d   : > { %v775_v29 = vpop.xlane.xlu0 %774 }
 0x42e   : > { %1277 = vrcp.f32 %v775_v29 }
 0x438   : > { %v1278_v39 = vpop.eup %1277 }
 0x446   : > { %v469_v15 = vpop.f32.mrb[4].mxu0 }
 0x447   : > { %v475_v16 = vmul.f32 %v1272_v14, %v469_v15  ;;  %v1108_v17 = vpop.f32.mrb[5].mxu0 }
 0x448   : > { %v472_v18 = vpop.f32.mrb[6].mxu0 }
 0x449   : > { %v476_v19 = vpack.c.bf16 %v475_v16, %v475_v16  ;;  %v1109_v20 = vpop.f32.mrb[7].mxu0 }
 0x44b   : > { %478 = vst.msk [vmem:[#allocation2] sm:$0xf] %vm477_vm4, %v476_v19 }
 0x44e   : > { %v582_v22 = vpop.f32.mrb[8].mxu0 }
 0x44f   : > { %v588_v23 = vmul.f32 %v1274_v21, %v582_v22  ;;  %v1120_v24 = vpop.f32.mrb[9].mxu0 }
 0x450   : > { %v585_v25 = vpop.f32.mrb[10].mxu0 }
 0x451   : > { %v1065_v26 = vpack.c.bf16 %v588_v23, %v588_v23  ;;  %v1121_v27 = vpop.f32.mrb[11].mxu0 }
 0x453   : > { %593 = vrot.lane.b32.xlu0 %v1065_v26, %s1517_s30 }
 0x46b   : > { %v701_v31 = vpop.f32.mrb[12].mxu0 }
 0x46c   : > { %v707_v33 = vmul.f32 %v1276_v30, %v701_v31  ;;  %v1132_v34 = vpop.f32.mrb[13].mxu0 }
 0x46d   : > { %v704_v35 = vpop.f32.mrb[14].mxu0 }
 0x46e   : > { %v1066_v37 = vpack.c.bf16 %v707_v33, %v707_v33  ;;  %v1133_v38 = vpop.f32.mrb[15].mxu0 }
 0x470   : > { %712 = vrot.lane.b32.xlu1 %v1066_v37, %s1518_s15 }
 0x474   : > { %v820_v40 = vpop.f32.mrb[16].mxu0 }
 0x475   : > { %v826_v41 = vmul.f32 %v1278_v39, %v820_v40  ;;  %v1144_v42 = vpop.f32.mrb[17].mxu0 }
 0x476   : > { %v823_v43 = vpop.f32.mrb[18].mxu0 }
 0x477   : > { %v1067_v44 = vpack.c.bf16 %v826_v41, %v826_v41  ;;  %v1145_v45 = vpop.f32.mrb[19].mxu0 }
 0x479   : > { %831 = vrot.lane.b32.xlu1 %v1067_v44, %s1519_s13 }
 0x4c5   : > { %v594_v46 = vpop.permute.xlu0 %593 }
 0x4c6   : > { %597 = vst.msk [vmem:[#allocation2] sm:$0xf] %vm596_vm5, %v594_v46 }
 0x4e2   : > { %v713_v47 = vpop.permute.xlu1 %712 }
 0x4e3   : > { %716 = vst.msk [vmem:[#allocation2] sm:$0xf] %vm715_vm6, %v713_v47 }
 0x4eb   : > { %v832_v0 = vpop.permute.xlu1 %831 }
 0x4ec   : > { %835 = vst.msk [vmem:[#allocation2] sm:$0xf] %vm834_vm7, %v832_v0 }
 0x4f3   : > { %v836_v48 = vld [vmem:[#allocation2] sm:$0xf] }
 0x4f4   : > { %1151 = vmatmul.mubr.msk.bf16.vlgmr.msra.gmra.mrb[16].mxu1 %vm320_vm1, %v836_v48 }
 0x5c7   : > { %v897_v50 = vpop.f32.mrb[16].mxu1 }
 0x5c8   : > { %v898_v51 = vadd.f32 %v1057_v49, %v897_v50  ;;  %v1152_v52 = vpop.f32.mrb[17].mxu1 }
 0x5c9   : > { %v900_v53 = vpop.f32.mrb[18].mxu1 }
 0x5ca   : > { %v1153_v54 = vpop.f32.mrb[19].mxu1  ;;  %903 = vst.msk [vmem:[%s293_s9] sm:$0xff] %vm320_vm1, %v898_v51 }
 0x5cb   : > { %1434 = shalt.err (!%p1431_p0)
}
 0x5cc   : > { %s1435_s11 = scalar_lea.hbm %s1864_s7, 128  ;;  %s1439_s30 = scalar_lea.hbm %s1914_s5, 256 }
 0x5cd   : > { %p1436_p2 = scmp.ne.s32.totalorder %s1864_s7, %s1435_s11  ;;  %p1440_p10 = scmp.lt.u32.totalorder %s1864_s7, %s1914_s5 }
 0x5ce   : > { %p1441_p11 = scmp.lt.u32.totalorder %s1439_s30, %s1435_s11  ;;  %p1443_p6 = scmp.lt.u32.totalorder %s1435_s11, %s1864_s7 }
 0x5cf   : > { %p1437_p8 = pnand %p1436_p2, %p1932_p5 }
 0x5d0   : > { %p1442_p1 = por %p1441_p11, %p1440_p10 }
 0x5d1   : > { %p1438_p4 = pneg %p1437_p8 }
 0x5d2   : > { %p1444_p7 = por %p1443_p6, %p1442_p1 }
 0x5d4   : > { %p1445_p9 = pnand %p1444_p7, %p1438_p4 }
 0x5d6   : > { %1448 = shalt.err (!%p1445_p9)
}
 0x5d7   : > { %1172 = dma.vmem_to_hbm [thread:$0]  (%p1932_p5), %s1866_s26, 128, %s1864_s7, %s905_s24  }
 0x5d8 PF: > { %s930_s25 = sand.u32 1, %s1483_s18   ;;  %p1933_p12 = scmp.ne.s32.totalorder %s1925_s12, 0 }
 0x5d9   : > { %p1934_p3 = scmp.ge.s32.totalorder %s1495_s21, 2  ;;  %s931_s9 = scalar_lea.sflag [#allocation5], %s930_s25 }
 0x5db   : > { %p1192_p13 = pnand %p1934_p3, %p1933_p12 }
 0x5dd   : > { %1478 = dma.done.wait (!%p1192_p13), %s931_s9, 128  }
 0x5de   : > { %1480 = vsyncadd (!%p1192_p13), %s931_s9, 4294967168  ;;  %p20_p0 = scmp.ge.s32.totalorder %s1692_s28, 4   ;;  %s1935_s18 = smov %s1487_s19 }
 0x5df   : > { %s1936_s19 = smov %s1491_s20  ;;  %s1937_s20 = smov %s1703_s16 }
 0x5e0   : > { %s1938_s21 = smov %s1692_s28  ;;  %22 = sbr.rel (!%p20_p0) target bundleno = 7 (0x7), region = 101 }
 0x5e7   :  { %936 = vsyncpa [#allocation4], 1 }
 0x5e8   :  { %938 = vsyncpa [#allocation4 + $0x1], 1 }
 0x5e9   :  { %939 = vsyncpa [#allocation7], 1 }
 0x5ea   :  { %940 = vsyncpa [#allocation10], 1 }
 0x5eb   :  { %941 = vsyncpa [#allocation5], 1 }
 0x5ec   :  { %943 = vsyncpa [#allocation5 + $0x1], 1 }

</bundles_post_ra>
